<compile_context>
chip_gen: v7x
topology: tpu7x:2x2x1
jax: 0.10.0
libtpu: 0.0.40
codegen_flags: <defaults>
</compile_context>

<pallas_src>
import math
import functools

import jax
import jax.numpy as jnp
from jax.experimental import pallas as pl
from jax.experimental.pallas import tpu as pltpu


def _round_up(v, m):
  return (v + m - 1) // m * m


# --------------------------------------------------------------------------
# Pallas kernel: bilinear combine (at (Kp, TP)) + modulation + weight matmul
# --------------------------------------------------------------------------
def _deform_conv3d_kernel(Hf, Wf,
                          v_ref, hs_ref, ws_ref, m_ref, w_ref, b_ref, o_ref):
  # v_ref  : (1, 4, C, Kp, TP)  bf16  gathered corners (h0w0, h0w1, h1w0, h1w1)
  # hs_ref : (1, Kp, TP)        f32   fractional h sampling coordinate
  # ws_ref : (1, Kp, TP)        f32   fractional w sampling coordinate
  # m_ref  : (1, Kp, TP)        f32   modulation * depth-validity
  # w_ref  : (C_out, C*Kp)      bf16  reshaped conv weight
  # b_ref  : (C_out, 1)         f32   bias
  # o_ref  : (1, C_out, TP)     f32   output tile
  h = hs_ref[0]
  w = ws_ref[0]
  m = m_ref[0]

  h0 = jnp.floor(h)
  w0 = jnp.floor(w)
  lh = h - h0
  lw = w - w0
  hh = 1.0 - lh
  hw = 1.0 - lw

  # per-corner validity (zero padding outside the (H, W) plane)
  vh0 = jnp.where((h0 >= 0.0) & (h0 <= Hf - 1.0), 1.0, 0.0)
  vh1 = jnp.where((h0 + 1.0 >= 0.0) & (h0 + 1.0 <= Hf - 1.0), 1.0, 0.0)
  vw0 = jnp.where((w0 >= 0.0) & (w0 <= Wf - 1.0), 1.0, 0.0)
  vw1 = jnp.where((w0 + 1.0 >= 0.0) & (w0 + 1.0 <= Wf - 1.0), 1.0, 0.0)

  # bilinear coefficients once per (tap, position): shape (Kp, TP)
  c00 = hh * hw * vh0 * vw0 * m
  c01 = hh * lw * vh0 * vw1 * m
  c10 = lh * hw * vh1 * vw0 * m
  c11 = lh * lw * vh1 * vw1 * m

  v0 = v_ref[0, 0].astype(jnp.float32)   # (C, Kp, TP)
  v1 = v_ref[0, 1].astype(jnp.float32)
  v2 = v_ref[0, 2].astype(jnp.float32)
  v3 = v_ref[0, 3].astype(jnp.float32)

  # broadcast over the channel (leading) dim is free
  cols = v0 * c00[None] + v1 * c01[None] + v2 * c10[None] + v3 * c11[None]
  C, Kp, TP = cols.shape
  # Kp % 8 == 0 -> this merge is layout-preserving (no relayout copy)
  cols = cols.reshape(C * Kp, TP).astype(jnp.bfloat16)

  out = jnp.dot(w_ref[...], cols,
                preferred_element_type=jnp.float32) + b_ref[...]   # (C_out, TP)
  o_ref[0] = out.astype(o_ref.dtype)


# --------------------------------------------------------------------------
# Plain-JAX glue: index precompute + corner gather (data movement only)
# --------------------------------------------------------------------------
def _precompute_columns(x, offset, mask, kernel_size, stride, padding, dilation):
  N, C, D, H, W = x.shape
  kd, kh, kw = kernel_size
  sd, sh, sw = stride
  pd, ph, pw = padding
  dd, dh, dw = dilation
  K = kd * kh * kw

  Do = (D + 2 * pd - dd * (kd - 1) - 1) // sd + 1
  Ho = (H + 2 * ph - dh * (kh - 1) - 1) // sh + 1
  Wo = (W + 2 * pw - dw * (kw - 1) - 1) // sw + 1
  P = Do * Ho * Wo

  # kernel tap grid (K,) and output grid (P,)
  kdi, khi, kwi = jnp.meshgrid(jnp.arange(kd), jnp.arange(kh), jnp.arange(kw),
                               indexing="ij")
  kdi, khi, kwi = kdi.reshape(K), khi.reshape(K), kwi.reshape(K)
  odi, ohi, owi = jnp.meshgrid(jnp.arange(Do), jnp.arange(Ho), jnp.arange(Wo),
                               indexing="ij")
  odi, ohi, owi = odi.reshape(P), ohi.reshape(P), owi.reshape(P)

  d_in = odi[None, :] * sd - pd + kdi[:, None] * dd                 # (K, P) int
  h_base = (ohi[None, :] * sh - ph + khi[:, None] * dh).astype(jnp.float32)
  w_base = (owi[None, :] * sw - pw + kwi[:, None] * dw).astype(jnp.float32)

  # offsets: channel 2k -> dh, 2k+1 -> dw  (deformable_groups == 1)
  off = offset.reshape(N, K, 2, P).astype(jnp.float32)
  off_h = off[:, :, 0, :]
  off_w = off[:, :, 1, :]

  h_s = h_base[None] + off_h                                        # (N, K, P)
  w_s = w_base[None] + off_w
  d_valid = ((d_in >= 0) & (d_in < D)).astype(jnp.float32)          # (K, P)
  d_c = jnp.clip(d_in, 0, D - 1)

  # fold depth validity into the modulation mask (both multiplicative gates)
  m = mask.reshape(N, K, P).astype(jnp.float32) * d_valid[None]

  h0 = jnp.floor(h_s).astype(jnp.int32)
  w0 = jnp.floor(w_s).astype(jnp.int32)
  h0c = jnp.clip(h0, 0, H - 1)
  h1c = jnp.clip(h0 + 1, 0, H - 1)
  w0c = jnp.clip(w0, 0, W - 1)
  w1c = jnp.clip(w0 + 1, 0, W - 1)

  base = (d_c * (H * W))[None]                                      # (1, K, P)
  idx = jnp.stack([base + h0c * W + w0c,
                   base + h0c * W + w1c,
                   base + h1c * W + w0c,
                   base + h1c * W + w1c], axis=1)                   # (N, 4, K, P)

  # corner gather: indices shared across channels (no C-broadcast of idx)
  # TODO(synk): the dynamic gather itself has no clean rectangular-BlockSpec
  # Pallas equivalent; an in-kernel version needs pl.ANY + per-tap manual DMA.
  x_flat = x.reshape(N, C, D * H * W).astype(jnp.float32)
  idx_flat = idx.reshape(N, 4 * K * P)
  gathered = jax.vmap(lambda xc, ix: jnp.take(xc, ix, axis=1))(x_flat, idx_flat)
  V = gathered.reshape(N, C, 4, K, P).transpose(0, 2, 1, 3, 4)      # (N,4,C,K,P)

  return V, h_s.astype(jnp.float32), w_s.astype(jnp.float32), m, (Do, Ho, Wo)


def _choose_tile_p(C, Kp, C_out, P,
                   budget_bytes=12 * 1024 * 1024, max_tp=2048):
  """Largest lane-tile (multiple of 128) whose double-buffered footprint stays
  well inside the smallest (v7x 32 MiB scoped / 64 MiB physical) VMEM."""
  per_lane = 4 * C * Kp * 2 + 3 * Kp * 4 + C_out * 4   # V(bf16) + coeffs + out
  tp = (budget_bytes // per_lane) // 128 * 128
  tp = max(128, min(tp, max_tp))
  tp = min(tp, _round_up(P, 128))
  return tp


# --------------------------------------------------------------------------
# Wrapper
# --------------------------------------------------------------------------
def deform_conv3d(x, offset, mask, weight, bias, *,
                  stride=(1, 1, 1), padding=(0, 0, 0), dilation=(1, 1, 1),
                  groups=1, deformable_groups=1):
  assert groups == 1 and deformable_groups == 1, "only groups=dg=1 supported"
  N, C, D, H, W = x.shape
  C_out = weight.shape[0]
  kd, kh, kw = weight.shape[2:]
  K = kd * kh * kw
  assert offset.shape[1] == 2 * deformable_groups * K
  assert mask.shape[1] == deformable_groups * K

  V, hs, ws, m, (Do, Ho, Wo) = _precompute_columns(
      x, offset, mask, (kd, kh, kw), stride, padding, dilation)
  P = Do * Ho * Wo

  # pad K to a multiple of 8 (layout-free sublane merge inside the kernel) and
  # P to a multiple of the lane tile.
  Kp = _round_up(K, 8)
  TP = _choose_tile_p(C, Kp, C_out, P)
  Pp = _round_up(P, TP)
  pad_k, pad_p = Kp - K, Pp - P

  V = jnp.pad(V, ((0, 0), (0, 0), (0, 0), (0, pad_k), (0, pad_p)))
  hs = jnp.pad(hs, ((0, 0), (0, pad_k), (0, pad_p)))
  ws = jnp.pad(ws, ((0, 0), (0, pad_k), (0, pad_p)))
  m = jnp.pad(m, ((0, 0), (0, pad_k), (0, pad_p)))

  V = V.astype(jnp.bfloat16)
  Wm = jnp.pad(weight.reshape(C_out, C, K).astype(jnp.float32),
               ((0, 0), (0, 0), (0, pad_k))).reshape(C_out, C * Kp)
  Wm = Wm.astype(jnp.bfloat16)
  bm = bias.reshape(C_out, 1).astype(jnp.float32)

  kern = functools.partial(_deform_conv3d_kernel, float(H), float(W))

  out = pl.pallas_call(
      kern,
      out_shape=jax.ShapeDtypeStruct((N, C_out, Pp), jnp.float32),
      grid=(N, Pp // TP),
      in_specs=[
          pl.BlockSpec((1, 4, C, Kp, TP), lambda n, p: (n, 0, 0, 0, p)),
          pl.BlockSpec((1, Kp, TP), lambda n, p: (n, 0, p)),
          pl.BlockSpec((1, Kp, TP), lambda n, p: (n, 0, p)),
          pl.BlockSpec((1, Kp, TP), lambda n, p: (n, 0, p)),
          pl.BlockSpec((C_out, C * Kp), lambda n, p: (0, 0)),
          pl.BlockSpec((C_out, 1), lambda n, p: (0, 0)),
      ],
      out_specs=pl.BlockSpec((1, C_out, TP), lambda n, p: (n, 0, p)),
      compiler_params=pltpu.CompilerParams(
          dimension_semantics=("parallel", "parallel"),
          vmem_limit_bytes=48 * 1024 * 1024),
  )(V, hs, ws, m, Wm, bm)

  return out[:, :, :P].reshape(N, C_out, Do, Ho, Wo)


# --------------------------------------------------------------------------
# Independent pure-JAX f32 reference (recomputed from the raw inputs)
# --------------------------------------------------------------------------
def _reference_deform_conv3d(x, offset, mask, weight, bias,
                             stride, padding, dilation):
  N, C, D, H, W = x.shape
  C_out = weight.shape[0]
  kd, kh, kw = weight.shape[2], weight.shape[3], weight.shape[4]
  sd, sh, sw = stride
  pd, ph, pw = padding
  dd, dh, dw = dilation
  K = kd * kh * kw
  Do = (D + 2 * pd - dd * (kd - 1) - 1) // sd + 1
  Ho = (H + 2 * ph - dh * (kh - 1) - 1) // sh + 1
  Wo = (W + 2 * pw - dw * (kw - 1) - 1) // sw + 1
  P = Do * Ho * Wo

  kdi, khi, kwi = jnp.meshgrid(jnp.arange(kd), jnp.arange(kh), jnp.arange(kw),
                               indexing="ij")
  kdi, khi, kwi = kdi.reshape(K), khi.reshape(K), kwi.reshape(K)
  odi, ohi, owi = jnp.meshgrid(jnp.arange(Do), jnp.arange(Ho), jnp.arange(Wo),
                               indexing="ij")
  odi, ohi, owi = odi.reshape(P), ohi.reshape(P), owi.reshape(P)

  d_in = odi[None] * sd - pd + kdi[:, None] * dd                    # (K, P)
  h_base = (ohi[None] * sh - ph + khi[:, None] * dh).astype(jnp.float32)
  w_base = (owi[None] * sw - pw + kwi[:, None] * dw).astype(jnp.float32)

  off = offset.reshape(N, K, 2, P).astype(jnp.float32)
  h_s = h_base[None] + off[:, :, 0]
  w_s = w_base[None] + off[:, :, 1]
  m = mask.reshape(N, K, P).astype(jnp.float32)
  d_valid = ((d_in >= 0) & (d_in < D)).astype(jnp.float32)
  d_c = jnp.clip(d_in, 0, D - 1)

  def sample_one(xn, hs, ws, mn):
    h0 = jnp.floor(hs)
    w0 = jnp.floor(ws)
    lh, lw = hs - h0, ws - w0
    hh, hw = 1.0 - lh, 1.0 - lw

    def corner(hc, wc, wt):
      valid = ((hc >= 0) & (hc <= H - 1) &
               (wc >= 0) & (wc <= W - 1)).astype(jnp.float32)
      hi = jnp.clip(hc, 0, H - 1).astype(jnp.int32)
      wi = jnp.clip(wc, 0, W - 1).astype(jnp.int32)
      vals = xn[:, d_c, hi, wi]                                     # (C, K, P)
      return vals * (wt * valid)[None]

    cols = (corner(h0, w0, hh * hw) + corner(h0, w0 + 1, hh * lw) +
            corner(h0 + 1, w0, lh * hw) + corner(h0 + 1, w0 + 1, lh * lw))
    return cols * (mn * d_valid)[None]                              # (C, K, P)

  cols = jax.vmap(sample_one)(x.astype(jnp.float32), h_s, w_s, m)   # (N,C,K,P)
  Wm = weight.reshape(C_out, C * K).astype(jnp.float32)
  out = jnp.einsum("ok,nkp->nop", Wm, cols.reshape(N, C * K, P))
  out = out + bias.reshape(1, C_out, 1).astype(jnp.float32)
  return out.reshape(N, C_out, Do, Ho, Wo)


if __name__ == "__main__":
  # Small module config (matches DeformConv3d(__init__) shapes).
  N, C_in, C_out = 2, 4, 8
  D, H, W = 4, 8, 8
  ksz, strd, pad, dil = (3, 3, 3), (1, 1, 1), (1, 1, 1), (1, 1, 1)
  K = ksz[0] * ksz[1] * ksz[2]
  Do, Ho, Wo = D, H, W  # stride 1, pad 1, k 3

  key = jax.random.PRNGKey(0)
  kx, ko, km, kw_, kb = jax.random.split(key, 5)

  x = jax.random.normal(kx, (N, C_in, D, H, W), jnp.float32)
  offset = 1.5 * jax.random.normal(ko, (N, 2 * K, Do, Ho, Wo), jnp.float32)
  mask = jax.nn.sigmoid(jax.random.normal(km, (N, K, Do, Ho, Wo), jnp.float32))

  # Parameter init mimicking reset_parameters():
  # kaiming_uniform_(a=sqrt(5)) -> U(-1/sqrt(fan_in), 1/sqrt(fan_in)); same bound for bias.
  fan_in = C_in * K
  bound = 1.0 / math.sqrt(fan_in)
  weight = jax.random.uniform(kw_, (C_out, C_in) + ksz, jnp.float32,
                              minval=-bound, maxval=bound)
  bias = jax.random.uniform(kb, (C_out,), jnp.float32, minval=-bound, maxval=bound)

  out = deform_conv3d(x, offset, mask, weight, bias,
                      stride=strd, padding=pad, dilation=dil)
  out = jax.block_until_ready(out)
  assert out.shape == (N, C_out, Do, Ho, Wo)

  # correctness check against an independent f32 reference (bf16 V/weights in
  # the kernel -> looser tolerance than pure f32)
  ref = _reference_deform_conv3d(x, offset, mask, weight, bias, strd, pad, dil)
  ref = jax.block_until_ready(ref)
  assert jnp.allclose(out, ref, atol=2e-2, rtol=2e-2), (
      "mismatch vs reference, max abs diff = %f" % float(jnp.max(jnp.abs(out - ref))))

  print("KERNEL_OK")
</pallas_src>

<mosaic_0001>
module attributes {stable_mosaic.version = 11 : i64} {
  func.func @_deform_conv3d_kernel(%arg0: i32, %arg1: i32, %arg2: memref<1x4x4x32x256xbf16, #tpu.memory_space<vmem>>, %arg3: memref<1x32x256xf32, #tpu.memory_space<vmem>>, %arg4: memref<1x32x256xf32, #tpu.memory_space<vmem>>, %arg5: memref<1x32x256xf32, #tpu.memory_space<vmem>>, %arg6: memref<8x128xbf16, #tpu.memory_space<vmem>>, %arg7: memref<8x1xf32, #tpu.memory_space<vmem>>, %arg8: memref<1x8x256xf32, #tpu.memory_space<vmem>>) attributes {dimension_semantics = [#tpu.dimension_semantics<parallel>, #tpu.dimension_semantics<parallel>], iteration_bounds = array<i64: 2, 1>, scalar_prefetch = 0 : i64, scratch_operands = 0 : i64, tpu.core_type = #tpu.core_type<tc>, window_params = [{transform_indices = @transform_0, window_bounds = array<i64: 1, 4, 4, 32, 256>}, {transform_indices = @transform_1, window_bounds = array<i64: 1, 32, 256>}, {transform_indices = @transform_2, window_bounds = array<i64: 1, 32, 256>}, {transform_indices = @transform_3, window_bounds = array<i64: 1, 32, 256>}, {pipeline_mode = #tpu.pipeline_mode<synchronous>, transform_indices = @transform_4, window_bounds = array<i64: 8, 128>}, {pipeline_mode = #tpu.pipeline_mode<synchronous>, transform_indices = @transform_5, window_bounds = array<i64: 8, 1>}, {transform_indices = @transform_6, window_bounds = array<i64: 1, 8, 256>}]} {
    %c0 = arith.constant 0 : index
    %c0_0 = arith.constant 0 : index
    %c0_1 = arith.constant 0 : index
    %0 = vector.load %arg3[%c0, %c0_0, %c0_1] : memref<1x32x256xf32, #tpu.memory_space<vmem>>, vector<1x32x256xf32>
    %1 = vector.shape_cast %0 : vector<1x32x256xf32> to vector<32x256xf32>
    %c0_2 = arith.constant 0 : index
    %c0_3 = arith.constant 0 : index
    %c0_4 = arith.constant 0 : index
    %2 = vector.load %arg4[%c0_2, %c0_3, %c0_4] : memref<1x32x256xf32, #tpu.memory_space<vmem>>, vector<1x32x256xf32>
    %3 = vector.shape_cast %2 : vector<1x32x256xf32> to vector<32x256xf32>
    %c0_5 = arith.constant 0 : index
    %c0_6 = arith.constant 0 : index
    %c0_7 = arith.constant 0 : index
    %4 = vector.load %arg5[%c0_5, %c0_6, %c0_7] : memref<1x32x256xf32, #tpu.memory_space<vmem>>, vector<1x32x256xf32>
    %5 = vector.shape_cast %4 : vector<1x32x256xf32> to vector<32x256xf32>
    %6 = math.floor %1 : vector<32x256xf32>
    %7 = math.floor %3 : vector<32x256xf32>
    %8 = arith.subf %1, %6 : vector<32x256xf32>
    %9 = arith.subf %3, %7 : vector<32x256xf32>
    %cst = arith.constant 1.000000e+00 : f32
    %10 = vector.broadcast %cst : f32 to vector<32x256xf32>
    %11 = arith.subf %10, %8 : vector<32x256xf32>
    %cst_8 = arith.constant 1.000000e+00 : f32
    %12 = vector.broadcast %cst_8 : f32 to vector<32x256xf32>
    %13 = arith.subf %12, %9 : vector<32x256xf32>
    %cst_9 = arith.constant 0.000000e+00 : f32
    %14 = vector.broadcast %cst_9 : f32 to vector<32x256xf32>
    %15 = arith.cmpf oge, %6, %14 : vector<32x256xf32>
    %cst_10 = arith.constant 7.000000e+00 : f32
    %16 = vector.broadcast %cst_10 : f32 to vector<32x256xf32>
    %17 = arith.cmpf ole, %6, %16 : vector<32x256xf32>
    %18 = arith.andi %15, %17 : vector<32x256xi1>
    %cst_11 = arith.constant 1.000000e+00 : f32
    %cst_12 = arith.constant 0.000000e+00 : f32
    %19 = vector.broadcast %cst_11 : f32 to vector<32x256xf32>
    %20 = vector.broadcast %cst_12 : f32 to vector<32x256xf32>
    %21 = arith.select %18, %19, %20 : vector<32x256xi1>, vector<32x256xf32>
    %cst_13 = arith.constant 1.000000e+00 : f32
    %22 = vector.broadcast %cst_13 : f32 to vector<32x256xf32>
    %23 = arith.addf %6, %22 : vector<32x256xf32>
    %cst_14 = arith.constant 0.000000e+00 : f32
    %24 = vector.broadcast %cst_14 : f32 to vector<32x256xf32>
    %25 = arith.cmpf oge, %23, %24 : vector<32x256xf32>
    %cst_15 = arith.constant 1.000000e+00 : f32
    %26 = vector.broadcast %cst_15 : f32 to vector<32x256xf32>
    %27 = arith.addf %6, %26 : vector<32x256xf32>
    %cst_16 = arith.constant 7.000000e+00 : f32
    %28 = vector.broadcast %cst_16 : f32 to vector<32x256xf32>
    %29 = arith.cmpf ole, %27, %28 : vector<32x256xf32>
    %30 = arith.andi %25, %29 : vector<32x256xi1>
    %cst_17 = arith.constant 1.000000e+00 : f32
    %cst_18 = arith.constant 0.000000e+00 : f32
    %31 = vector.broadcast %cst_17 : f32 to vector<32x256xf32>
    %32 = vector.broadcast %cst_18 : f32 to vector<32x256xf32>
    %33 = arith.select %30, %31, %32 : vector<32x256xi1>, vector<32x256xf32>
    %cst_19 = arith.constant 0.000000e+00 : f32
    %34 = vector.broadcast %cst_19 : f32 to vector<32x256xf32>
    %35 = arith.cmpf oge, %7, %34 : vector<32x256xf32>
    %cst_20 = arith.constant 7.000000e+00 : f32
    %36 = vector.broadcast %cst_20 : f32 to vector<32x256xf32>
    %37 = arith.cmpf ole, %7, %36 : vector<32x256xf32>
    %38 = arith.andi %35, %37 : vector<32x256xi1>
    %cst_21 = arith.constant 1.000000e+00 : f32
    %cst_22 = arith.constant 0.000000e+00 : f32
    %39 = vector.broadcast %cst_21 : f32 to vector<32x256xf32>
    %40 = vector.broadcast %cst_22 : f32 to vector<32x256xf32>
    %41 = arith.select %38, %39, %40 : vector<32x256xi1>, vector<32x256xf32>
    %cst_23 = arith.constant 1.000000e+00 : f32
    %42 = vector.broadcast %cst_23 : f32 to vector<32x256xf32>
    %43 = arith.addf %7, %42 : vector<32x256xf32>
    %cst_24 = arith.constant 0.000000e+00 : f32
    %44 = vector.broadcast %cst_24 : f32 to vector<32x256xf32>
    %45 = arith.cmpf oge, %43, %44 : vector<32x256xf32>
    %cst_25 = arith.constant 1.000000e+00 : f32
    %46 = vector.broadcast %cst_25 : f32 to vector<32x256xf32>
    %47 = arith.addf %7, %46 : vector<32x256xf32>
    %cst_26 = arith.constant 7.000000e+00 : f32
    %48 = vector.broadcast %cst_26 : f32 to vector<32x256xf32>
    %49 = arith.cmpf ole, %47, %48 : vector<32x256xf32>
    %50 = arith.andi %45, %49 : vector<32x256xi1>
    %cst_27 = arith.constant 1.000000e+00 : f32
    %cst_28 = arith.constant 0.000000e+00 : f32
    %51 = vector.broadcast %cst_27 : f32 to vector<32x256xf32>
    %52 = vector.broadcast %cst_28 : f32 to vector<32x256xf32>
    %53 = arith.select %50, %51, %52 : vector<32x256xi1>, vector<32x256xf32>
    %54 = arith.mulf %11, %13 : vector<32x256xf32>
    %55 = arith.mulf %54, %21 : vector<32x256xf32>
    %56 = arith.mulf %55, %41 : vector<32x256xf32>
    %57 = arith.mulf %56, %5 : vector<32x256xf32>
    %58 = arith.mulf %11, %9 : vector<32x256xf32>
    %59 = arith.mulf %58, %21 : vector<32x256xf32>
    %60 = arith.mulf %59, %53 : vector<32x256xf32>
    %61 = arith.mulf %60, %5 : vector<32x256xf32>
    %62 = arith.mulf %8, %13 : vector<32x256xf32>
    %63 = arith.mulf %62, %33 : vector<32x256xf32>
    %64 = arith.mulf %63, %41 : vector<32x256xf32>
    %65 = arith.mulf %64, %5 : vector<32x256xf32>
    %66 = arith.mulf %8, %9 : vector<32x256xf32>
    %67 = arith.mulf %66, %33 : vector<32x256xf32>
    %68 = arith.mulf %67, %53 : vector<32x256xf32>
    %69 = arith.mulf %68, %5 : vector<32x256xf32>
    %c0_29 = arith.constant 0 : index
    %c0_30 = arith.constant 0 : index
    %c0_31 = arith.constant 0 : index
    %c0_32 = arith.constant 0 : index
    %c0_33 = arith.constant 0 : index
    %70 = vector.load %arg2[%c0_29, %c0_30, %c0_31, %c0_32, %c0_33] : memref<1x4x4x32x256xbf16, #tpu.memory_space<vmem>>, vector<1x1x4x32x256xbf16>
    %71 = vector.shape_cast %70 : vector<1x1x4x32x256xbf16> to vector<4x32x256xbf16>
    %72 = arith.extf %71 : vector<4x32x256xbf16> to vector<4x32x256xf32>
    %c0_34 = arith.constant 0 : index
    %c1 = arith.constant 1 : index
    %c0_35 = arith.constant 0 : index
    %c0_36 = arith.constant 0 : index
    %c0_37 = arith.constant 0 : index
    %73 = vector.load %arg2[%c0_34, %c1, %c0_35, %c0_36, %c0_37] : memref<1x4x4x32x256xbf16, #tpu.memory_space<vmem>>, vector<1x1x4x32x256xbf16>
    %74 = vector.shape_cast %73 : vector<1x1x4x32x256xbf16> to vector<4x32x256xbf16>
    %75 = arith.extf %74 : vector<4x32x256xbf16> to vector<4x32x256xf32>
    %c0_38 = arith.constant 0 : index
    %c2 = arith.constant 2 : index
    %c0_39 = arith.constant 0 : index
    %c0_40 = arith.constant 0 : index
    %c0_41 = arith.constant 0 : index
    %76 = vector.load %arg2[%c0_38, %c2, %c0_39, %c0_40, %c0_41] : memref<1x4x4x32x256xbf16, #tpu.memory_space<vmem>>, vector<1x1x4x32x256xbf16>
    %77 = vector.shape_cast %76 : vector<1x1x4x32x256xbf16> to vector<4x32x256xbf16>
    %78 = arith.extf %77 : vector<4x32x256xbf16> to vector<4x32x256xf32>
    %c0_42 = arith.constant 0 : index
    %c3 = arith.constant 3 : index
    %c0_43 = arith.constant 0 : index
    %c0_44 = arith.constant 0 : index
    %c0_45 = arith.constant 0 : index
    %79 = vector.load %arg2[%c0_42, %c3, %c0_43, %c0_44, %c0_45] : memref<1x4x4x32x256xbf16, #tpu.memory_space<vmem>>, vector<1x1x4x32x256xbf16>
    %80 = vector.shape_cast %79 : vector<1x1x4x32x256xbf16> to vector<4x32x256xbf16>
    %81 = arith.extf %80 : vector<4x32x256xbf16> to vector<4x32x256xf32>
    %82 = vector.shape_cast %57 : vector<32x256xf32> to vector<1x32x256xf32>
    %83 = vector.broadcast %82 : vector<1x32x256xf32> to vector<4x32x256xf32>
    %84 = arith.mulf %72, %83 : vector<4x32x256xf32>
    %85 = vector.shape_cast %61 : vector<32x256xf32> to vector<1x32x256xf32>
    %86 = vector.broadcast %85 : vector<1x32x256xf32> to vector<4x32x256xf32>
    %87 = arith.mulf %75, %86 : vector<4x32x256xf32>
    %88 = arith.addf %84, %87 : vector<4x32x256xf32>
    %89 = vector.shape_cast %65 : vector<32x256xf32> to vector<1x32x256xf32>
    %90 = vector.broadcast %89 : vector<1x32x256xf32> to vector<4x32x256xf32>
    %91 = arith.mulf %78, %90 : vector<4x32x256xf32>
    %92 = arith.addf %88, %91 : vector<4x32x256xf32>
    %93 = vector.shape_cast %69 : vector<32x256xf32> to vector<1x32x256xf32>
    %94 = vector.broadcast %93 : vector<1x32x256xf32> to vector<4x32x256xf32>
    %95 = arith.mulf %81, %94 : vector<4x32x256xf32>
    %96 = arith.addf %92, %95 : vector<4x32x256xf32>
    %97 = vector.shape_cast %96 : vector<4x32x256xf32> to vector<128x256xf32>
    %98 = arith.truncf %97 : vector<128x256xf32> to vector<128x256xbf16>
    %c0_46 = arith.constant 0 : index
    %c0_47 = arith.constant 0 : index
    %99 = vector.load %arg6[%c0_46, %c0_47] : memref<8x128xbf16, #tpu.memory_space<vmem>>, vector<8x128xbf16>
    %cst_48 = arith.constant dense<0.000000e+00> : vector<8x256xf32>
    %100 = tpu.matmul %99, %98, %cst_48 {dimension_numbers = #tpu.dot_dimension_numbers<[1], [0], [0], [1], [0, 0, 1, 1], [], []>} : vector<8x128xbf16>, vector<128x256xbf16>, vector<8x256xf32> -> vector<8x256xf32>
    %c0_49 = arith.constant 0 : index
    %c0_50 = arith.constant 0 : index
    %101 = vector.load %arg7[%c0_49, %c0_50] : memref<8x1xf32, #tpu.memory_space<vmem>>, vector<8x1xf32>
    %102 = vector.broadcast %101 : vector<8x1xf32> to vector<8x256xf32>
    %103 = arith.addf %100, %102 : vector<8x256xf32>
    %c0_51 = arith.constant 0 : index
    %c0_52 = arith.constant 0 : index
    %c0_53 = arith.constant 0 : index
    %104 = vector.load %arg8[%c0_51, %c0_52, %c0_53] : memref<1x8x256xf32, #tpu.memory_space<vmem>>, vector<1x8x256xf32>
    %105 = vector.shape_cast %104 : vector<1x8x256xf32> to vector<8x256xf32>
    %106 = vector.shape_cast %103 : vector<8x256xf32> to vector<1x8x256xf32>
    tpu.vector_store %arg8[%c0_51, %c0_52, %c0_53], %106 {strides = array<i32>} : memref<1x8x256xf32, #tpu.memory_space<vmem>>, vector<1x8x256xf32>,
    return
  }
  func.func @transform_0(%arg0: i32, %arg1: i32) -> (i32, i32, i32, i32, i32) {
    %c0_i32 = arith.constant 0 : i32
    %c0_i32_0 = arith.constant 0 : i32
    %c0_i32_1 = arith.constant 0 : i32
    %c0_i32_2 = arith.constant 0 : i32
    return %arg0, %c0_i32, %c0_i32_0, %c0_i32_1, %arg1 : i32, i32, i32, i32, i32
  }
  func.func @transform_1(%arg0: i32, %arg1: i32) -> (i32, i32, i32) {
    %c0_i32 = arith.constant 0 : i32
    %c0_i32_0 = arith.constant 0 : i32
    return %arg0, %c0_i32, %arg1 : i32, i32, i32
  }
  func.func @transform_2(%arg0: i32, %arg1: i32) -> (i32, i32, i32) {
    %c0_i32 = arith.constant 0 : i32
    %c0_i32_0 = arith.constant 0 : i32
    return %arg0, %c0_i32, %arg1 : i32, i32, i32
  }
  func.func @transform_3(%arg0: i32, %arg1: i32) -> (i32, i32, i32) {
    %c0_i32 = arith.constant 0 : i32
    %c0_i32_0 = arith.constant 0 : i32
    return %arg0, %c0_i32, %arg1 : i32, i32, i32
  }
  func.func @transform_4(%arg0: i32, %arg1: i32) -> (i32, i32) {
    %c0_i32 = arith.constant 0 : i32
    %c0_i32_0 = arith.constant 0 : i32
    %c0_i32_1 = arith.constant 0 : i32
    return %c0_i32, %c0_i32_0 : i32, i32
  }
  func.func @transform_5(%arg0: i32, %arg1: i32) -> (i32, i32) {
    %c0_i32 = arith.constant 0 : i32
    %c0_i32_0 = arith.constant 0 : i32
    %c0_i32_1 = arith.constant 0 : i32
    return %c0_i32, %c0_i32_0 : i32, i32
  }
  func.func @transform_6(%arg0: i32, %arg1: i32) -> (i32, i32, i32) {
    %c0_i32 = arith.constant 0 : i32
    %c0_i32_0 = arith.constant 0 : i32
    return %arg0, %c0_i32, %arg1 : i32, i32, i32
  }
}

</mosaic_0001>

<bundles_post_ra>
// kernel: tpu_custom_call.1
= control target key start
LH: loop header
LB: loop body
LE: loop exit
PB: predicated region body
PF: predicated region fallthrough
CT: control target
= control target key end

     0   :  { %s2618_s0 = inlined_call_operand.hbm [shape: bf16[2,4,4,32,256], index: 0, kind: input, shape index: {}]   ;;  %s2619_s1 = inlined_call_operand.hbm [shape: f32[2,32,256], index: 1, kind: input, shape index: {}]   ;;  %s2620_s2 = inlined_call_operand.hbm [shape: f32[2,32,256], index: 2, kind: input, shape index: {}]   ;;  %s2621_s3 = inlined_call_operand.hbm [shape: f32[2,32,256], index: 3, kind: input, shape index: {}]   ;;  %s2622_s4 = inlined_call_operand.vmem [shape: bf16[8,128], index: 4, kind: input, shape index: {}]   ;;  %s2623_s5 = inlined_call_operand.vmem [shape: f32[8,1], index: 5, kind: input, shape index: {}]   ;;  %s2624_s6 = inlined_call_operand.hbm [shape: f32[2,8,256], index: 6, kind: output, shape index: {}]  }
   0x1   :  { %2641 = sst [smem:[#allocation23_spill]] %s2618_s0 }
   0x2   :  { %2642 = sst [smem:[#allocation24_spill]] %s2619_s1 }
   0x3   :  { %11 = vsyncpa [#allocation3], 0 }
   0x4   :  { %13 = vsyncpa [#allocation3 + $0x1], 0 }
   0x5   :  { %14 = vsyncpa [#allocation6], 0 }
   0x6   :  { %16 = vsyncpa [#allocation6 + $0x1], 0 }
   0x7   :  { %17 = vsyncpa [#allocation9], 0 }
   0x8   :  { %19 = vsyncpa [#allocation9 + $0x1], 0 }
   0x9   :  { %20 = vsyncpa [#allocation4], 0 }
   0xa   :  { %22 = vsyncpa [#allocation4 + $0x1], 0  ;;  %s1850_s21 = smov 0   ;;  %s1852_s22 = smov 0  }
   0xb   :  { %s1854_s23 = smov 0   ;;  %s1856_s24 = smov 0  }
   0xc   :  { %s1858_s25 = smov 0   ;;  %s1860_s26 = smov 0  }
   0xd LB: > { %2643 = sst [smem:[#allocation15_spill]] %s1782_s21  ;;  %s1881_s27 = sadd.s32 4294967295, %s1802_s26   ;;  %s1802_s26 = sphi %s1860_s26, %s28_s26   ;;  %s1798_s25 = sphi %s1858_s25, %s2679_s25   ;;  %s1794_s24 = sphi %s1856_s24, %s2678_s24   ;;  %s1790_s23 = sphi %s1854_s23, %s2674_s23   ;;  %s1786_s22 = sphi %s1852_s22, %s2677_s22   ;;  %s1782_s21 = sphi %s1850_s21, %s2676_s21  }
   0xe   : > { %2644 = sst [smem:[#allocation16_spill]] %s1790_s23  ;;  %s1429_s28 = sadd.s32 4294967294, %s1802_s26  }
   0xf   : > { %s40_s29 = sadd.s32 1, %s1798_s25  ;;  %s49_s30 = sadd.s32 1, %s1790_s23 }
  0x10   : > { %p42_p0 = scmp.ge.s32.totalorder %s40_s29, 2  ;;  %p56_p1 = scmp.ne.s32.totalorder %s1790_s23, %s1786_s22 }
  0x11   : > { %p57_p2 = scmp.eq.s32.totalorder %s1802_s26, 0  ;;  %p62_p3 = scmp.ne.s32.totalorder %s1786_s22, %s1782_s21 }
  0x12   : > { %s2681_s29 = smov (%p42_p0, %s40_s29), 0  ;;  %p63_p5 = scmp.eq.s32.totalorder %s1881_s27, 0 }
  0x13   : > { %2645 = sst [smem:[#allocation17_spill]] %s2681_s29  ;;  %p1893_p4 = por %p57_p2, %p56_p1 }
  0x14   : > { %s44_s8 = ssub.s32 %s1798_s25, %s2681_s29  ;;  %p214_p6 = scmp.eq.s32.totalorder %s1881_s27, 1 }
  0x15   : > { %p47_p7 = scmp.eq.s32.totalorder %s44_s8, 0  ;;  %p1901_p8 = por %p63_p5, %p62_p3 }
  0x16   : > { %p1905_p9 = por %p214_p6, %p56_p1  ;;  %p220_p10 = scmp.eq.s32.totalorder %s1429_s28, 1 }
  0x17   : > { %s2647_s9 = scalar_select %p1901_p8, 1, 0 }
  0x18   : > { %s2648_s10 = scalar_select %p1905_p9, 1, 0 }
  0x19   : > { %s1910_s11 = scalar_select %p47_p7, %s1790_s23, %s49_s30  }
  0x1a   : > { %p1912_p11 = por %p220_p10, %p62_p3  ;;  %p1535_p13 = scmp.lt.s32.totalorder %s1802_s26, 2 }
  0x1b   : > { %2649 = sst [smem:[#allocation18_spill]] %s1910_s11  ;;  %s1919_s13 = sand.u32 1, %s1790_s23  }
  0x1c   : > { %s2650_s12 = scalar_select %p1912_p11, 1, 0 }
  0x1d   : > { %s269_s14 = sand.u32 1, %s1802_s26   ;;  %s1923_s15 = sshll.u32 %s1919_s13, 6 }
  0x1e   : > { %2651 = sst [smem:[#allocation19_spill]] %s2650_s12  ;;  %p1927_p0 = pnand %p1535_p13, %p1893_p4 }
  0x1f   : > { %s1932_s17 = sshll.u32 %s1798_s25, 10  ;;  %s2653_s1 = sld [smem:[#allocation24_spill]] }
  0x20   : > { %s273_s28 = scalar_lea.vmem [#allocation5], %s1923_s15  ;;  %s1943_s7 = scalar_lea.sflag [#allocation6], %s269_s14 }
  0x21   : > { %s282_s30 = sshll.u32 %s273_s28, 4  ;;  %p1949_p2 = pneg %p1927_p0  ;;  %s1941_s30 = int_to_ptr.vmem [resolvable:$true] %s282_s30 }
  0x25   : > { %s1938_s20 = scalar_lea.hbm %s2653_s1, %s1932_s17  ;;  %s1597_s11 = scalar_lea.hbm %s2653_s1, 2048 }
  0x26   : > { %s1592_s8 = scalar_lea.hbm %s1938_s20, 1024  ;;  %p1598_p5 = scmp.lt.u32.totalorder %s1938_s20, %s2653_s1 }
  0x27   : > { %p1593_p1 = scmp.ne.s32.totalorder %s1938_s20, %s1592_s8  ;;  %p1599_p6 = scmp.lt.u32.totalorder %s1597_s11, %s1592_s8 }
  0x28   : > { %p1601_p10 = scmp.lt.u32.totalorder %s1592_s8, %s1938_s20 }
  0x29   : > { %p1595_p3 = pnand %p1949_p2, %p1593_p1  ;;  %p1600_p7 = por %p1599_p6, %p1598_p5 }
  0x2b   : > { %p1596_p4 = pneg %p1595_p3  ;;  %p1602_p13 = por %p1601_p10, %p1600_p7 }
  0x2d   : > { %p1603_p12 = pnand %p1602_p13, %p1596_p4 }
  0x2f   : > { %1606 = shalt.err (!%p1603_p12)
}
  0x30   : > { %s1607_s14 = scalar_lea.vmem %s1941_s30, 1024  ;;  %s1804_s18 = smov [#allocation5]  }
  0x31   : > { %p1608_p1 = scmp.ne.s32.totalorder %s1941_s30, %s1607_s14  ;;  %s1612_s19 = sshll.u32 %s1804_s18, 4  ;;  %s1613_s19 = int_to_ptr.vmem [resolvable:$false] %s1612_s19 }
  0x32   : > { %s1614_s23 = scalar_lea.vmem %s1613_s19, 2048  ;;  %p1615_p9 = scmp.lt.s32.totalorder %s1941_s30, %s1613_s19 }
  0x33   : > { %p1610_p3 = pnand %p1608_p1, %p1949_p2  ;;  %p1616_p8 = scmp.lt.s32.totalorder %s1614_s23, %s1607_s14 }
  0x35   : > { %p1611_p11 = pneg %p1610_p3  ;;  %p1617_p5 = por %p1616_p8, %p1615_p9 }
  0x37   : > { %p1618_p6 = pnand %p1617_p5, %p1611_p11 }
  0x39   : > { %1621 = shalt.err (!%p1618_p6)
}
  0x3a   : > { %s2631_s11 = smov 256   ;;  %s2633_s8 = smov 16  }
  0x3b   : > { %1524 = dma.hbm_to_vmem [thread:$0]  (!%p1927_p0), %s1938_s20, 1024, %s1941_s30, %s1943_s7, %s2631_s11, %s2631_s11, %s2633_s8  }
  0x3c   : > { %p1444_p8 = scmp.ge.s32.totalorder %s1802_s26, 1  ;;  %p336_p9 = scmp.lt.s32.totalorder %s1802_s26, 3 }
  0x3d   : > { %s1432_s14 = sshll.u32 %s1919_s13, 9  ;;  %s1503_s18 = sshll.u32 %s1798_s25, 13 }
  0x3e   : > { %p1978_p11 = pnand %p1444_p8, %p336_p9  ;;  %s2656_s0 = sld [smem:[#allocation23_spill]] }
  0x3f   : > { %s250_s12 = scalar_lea.vmem [#allocation2], %s1432_s14  ;;  %s247_s20 = scalar_lea.sflag [#allocation3], %s1919_s13 }
  0x40   : > { %s2655_s28 = scalar_select %p1978_p11, 1, 0 }
  0x41   : > { %s259_s21 = sshll.u32 %s250_s12, 4  ;;  %s1989_s21 = int_to_ptr.vmem [resolvable:$true] %s259_s21 }
  0x44   : > { %s1987_s1 = scalar_lea.hbm %s2656_s0, %s1503_s18  ;;  %s1627_s19 = scalar_lea.hbm %s2656_s0, 16384 }
  0x45   : > { %s1622_s30 = scalar_lea.hbm %s1987_s1, 8192  ;;  %p1628_p10 = scmp.lt.u32.totalorder %s1987_s1, %s2656_s0 }
  0x46   : > { %p1623_p12 = scmp.ne.s32.totalorder %s1987_s1, %s1622_s30  ;;  %p1629_p13 = scmp.lt.u32.totalorder %s1627_s19, %s1622_s30 }
  0x47   : > { %p1631_p3 = scmp.lt.u32.totalorder %s1622_s30, %s1987_s1 }
  0x48   : > { %p1625_p4 = pnand %p1623_p12, %p1949_p2  ;;  %p1630_p1 = por %p1629_p13, %p1628_p10 }
  0x4a   : > { %p1626_p7 = pneg %p1625_p4  ;;  %p1632_p5 = por %p1631_p3, %p1630_p1 }
  0x4c   : > { %p1633_p6 = pnand %p1632_p5, %p1626_p7 }
  0x4e   : > { %1636 = shalt.err (!%p1633_p6)
}
  0x4f   : > { %s1637_s12 = scalar_lea.vmem %s1989_s21, 8192  ;;  %s1807_s11 = smov [#allocation2]  }
  0x50   : > { %p1638_p8 = scmp.ne.s32.totalorder %s1989_s21, %s1637_s12  ;;  %s1642_s8 = sshll.u32 %s1807_s11, 4  ;;  %s1643_s8 = int_to_ptr.vmem [resolvable:$false] %s1642_s8 }
  0x51   : > { %s1644_s14 = scalar_lea.vmem %s1643_s8, 16384  ;;  %p1645_p4 = scmp.lt.s32.totalorder %s1989_s21, %s1643_s8 }
  0x52   : > { %p1640_p9 = pnand %p1638_p8, %p1949_p2  ;;  %p1646_p11 = scmp.lt.s32.totalorder %s1644_s14, %s1637_s12 }
  0x54   : > { %p1641_p12 = pneg %p1640_p9  ;;  %p1647_p10 = por %p1646_p11, %p1645_p4 }
  0x56   : > { %p1648_p13 = pnand %p1647_p10, %p1641_p12 }
  0x58   : > { %1651 = shalt.err (!%p1648_p13)
}
  0x59   : > { %s1808_s30 = smov 128   ;;  %s1809_s19 = smov 8  }
  0x5a   : > { %1521 = dma.hbm_to_vmem [thread:$0]  (!%p1927_p0), %s1987_s1, 8192, %s1989_s21, %s247_s20, %s1808_s30, %s1808_s30, %s1809_s19  }
  0x5b   : > { %s2019_s11 = scalar_lea.hbm %s2620_s2, %s1932_s17  ;;  %s296_s12 = scalar_lea.vmem [#allocation7], %s1923_s15 }
  0x5c   : > { %s305_s8 = sshll.u32 %s296_s12, 4  ;;  %s1652_s14 = scalar_lea.hbm %s2019_s11, 1024  ;;  %s2022_s8 = int_to_ptr.vmem [resolvable:$true] %s305_s8 }
  0x5d   : > { %p1653_p11 = scmp.ne.s32.totalorder %s2019_s11, %s1652_s14  ;;  %s1657_s21 = scalar_lea.hbm %s2620_s2, 2048 }
  0x5e   : > { %p1658_p3 = scmp.lt.u32.totalorder %s2019_s11, %s2620_s2  ;;  %p1659_p5 = scmp.lt.u32.totalorder %s1657_s21, %s1652_s14 }
  0x5f   : > { %p1655_p7 = pnand %p1653_p11, %p1949_p2  ;;  %p1661_p8 = scmp.lt.u32.totalorder %s1652_s14, %s2019_s11 }
  0x60   : > { %p1660_p6 = por %p1659_p5, %p1658_p3 }
  0x61   : > { %p1656_p1 = pneg %p1655_p7 }
  0x62   : > { %p1662_p9 = por %p1661_p8, %p1660_p6 }
  0x64   : > { %p1663_p12 = pnand %p1662_p9, %p1656_p1 }
  0x66   : > { %1666 = shalt.err (!%p1663_p12)
}
  0x67   : > { %s1667_s19 = scalar_lea.vmem %s2022_s8, 1024  ;;  %s1810_s0 = smov [#allocation7]  }
  0x68   : > { %p1668_p4 = scmp.ne.s32.totalorder %s2022_s8, %s1667_s19  ;;  %s1672_s18 = sshll.u32 %s1810_s0, 4  ;;  %s1673_s18 = int_to_ptr.vmem [resolvable:$false] %s1672_s18 }
  0x69   : > { %s1674_s23 = scalar_lea.vmem %s1673_s18, 2048  ;;  %p1675_p11 = scmp.lt.s32.totalorder %s2022_s8, %s1673_s18 }
  0x6a   : > { %p1670_p10 = pnand %p1668_p4, %p1949_p2  ;;  %p1676_p7 = scmp.lt.s32.totalorder %s1674_s23, %s1667_s19 }
  0x6c   : > { %p1671_p13 = pneg %p1670_p10  ;;  %p1677_p3 = por %p1676_p7, %p1675_p11 }
  0x6e   : > { %p1678_p5 = pnand %p1677_p3, %p1671_p13 }
  0x70   : > { %1681 = shalt.err (!%p1678_p5)
}
  0x71   : > { %s2657_s12 = smov 16   ;;  %s2658_s14 = smov 256  }
  0x72   : > { %1527 = dma.hbm_to_vmem [thread:$0]  (!%p1927_p0), %s2019_s11, 1024, %s2022_s8, %s1943_s7, %s2658_s14, %s2658_s14, %s2657_s12  }
  0x73   : > { %s2053_s20 = scalar_lea.hbm %s2621_s3, %s1932_s17  ;;  %s319_s30 = scalar_lea.vmem [#allocation8], %s1923_s15 }
  0x74   : > { %s328_s19 = sshll.u32 %s319_s30, 4  ;;  %s316_s0 = scalar_lea.sflag [#allocation9], %s1919_s13  ;;  %s2056_s19 = int_to_ptr.vmem [resolvable:$true] %s328_s19 }
  0x75   : > { %s1682_s18 = scalar_lea.hbm %s2053_s20, 1024  ;;  %s1687_s8 = scalar_lea.hbm %s2621_s3, 2048 }
  0x76   : > { %p1683_p1 = scmp.ne.s32.totalorder %s2053_s20, %s1682_s18  ;;  %p1688_p9 = scmp.lt.u32.totalorder %s2053_s20, %s2621_s3 }
  0x77   : > { %p1689_p12 = scmp.lt.u32.totalorder %s1687_s8, %s1682_s18  ;;  %p1691_p10 = scmp.lt.u32.totalorder %s1682_s18, %s2053_s20 }
  0x78   : > { %p1685_p6 = pnand %p1683_p1, %p1949_p2 }
  0x79   : > { %p1690_p4 = por %p1689_p12, %p1688_p9 }
  0x7a   : > { %p1686_p8 = pneg %p1685_p6 }
  0x7b   : > { %p1692_p13 = por %p1691_p10, %p1690_p4 }
  0x7d   : > { %p1693_p11 = pnand %p1692_p13, %p1686_p8 }
  0x7f   : > { %1696 = shalt.err (!%p1693_p11)
}
  0x80   : > { %s1697_s15 = scalar_lea.vmem %s2056_s19, 1024  ;;  %s1811_s1 = smov [#allocation8]  }
  0x81   : > { %p1698_p7 = scmp.ne.s32.totalorder %s2056_s19, %s1697_s15  ;;  %s1702_s21 = sshll.u32 %s1811_s1, 4  ;;  %s1703_s21 = int_to_ptr.vmem [resolvable:$false] %s1702_s21 }
  0x82   : > { %s1704_s30 = scalar_lea.vmem %s1703_s21, 2048  ;;  %p1705_p1 = scmp.lt.s32.totalorder %s2056_s19, %s1703_s21 }
  0x83   : > { %p1700_p3 = pnand %p1698_p7, %p1949_p2  ;;  %p1706_p6 = scmp.lt.s32.totalorder %s1704_s30, %s1697_s15 }
  0x85   : > { %p1701_p5 = pneg %p1700_p3  ;;  %p1707_p9 = por %p1706_p6, %p1705_p1 }
  0x87   : > { %p1708_p12 = pnand %p1707_p9, %p1701_p5 }
  0x89   : > { %1711 = shalt.err (!%p1708_p12)
}
  0x8a   : > { %1530 = dma.hbm_to_vmem [thread:$0]  (!%p1927_p0), %s2053_s20, 1024, %s2056_s19, %s316_s0, %s2658_s14, %s2658_s14, %s2657_s12  }
  0x8b   : > { %p2659_p2 = scmp.ne.s32.totalorder %s2655_s28, 0 }
  0x8d   : > { %340 = sbr.rel (%p2659_p2) target bundleno = 562 (0x232), region = 44 }
  0x94   : > { %s2088_s29 = sand.u32 1, %s1786_s22   ;;  %p2660_p8 = scmp.ne.s32.totalorder %s2647_s9, 0 }
  0x95   : > { %s1445_s18 = sshll.u32 %s2088_s29, 9  ;;  %s343_s7 = scalar_lea.sflag [#allocation3], %s2088_s29 }
  0x96   : > { %s2092_s16 = scalar_lea.vmem [#allocation2], %s1445_s18 }
  0x97   : > { %1765 = dma.done.wait (%p2660_p8), %s343_s7, 8192  }
  0x98   : > { %1767 = vsyncadd (%p2660_p8), %s343_s7, 4294959104  ;;  %s351_s13 = sand.u32 1, %s1881_s27   ;;  %s1446_s28 = sshll.u32 %s2088_s29, 6 }
  0x99   : > { %s352_s12 = scalar_lea.sflag [#allocation6], %s351_s13  ;;  %s2100_s14 = scalar_lea.vmem [#allocation5], %s1446_s28 }
  0x9a   : > { %1769 = dma.done.wait (%p2660_p8), %s352_s12, 2048  }
  0x9b   : > { %1771 = vsyncadd (%p2660_p8), %s352_s12, 4294965248  ;;  %s2106_s20 = scalar_lea.vmem [#allocation7], %s1446_s28  ;;  %s370_s19 = scalar_lea.sflag [#allocation9], %s2088_s29 }
  0x9c   : > { %s2109_s0 = scalar_lea.vmem [#allocation8], %s1446_s28 }
  0x9d   : > { %1773 = dma.done.wait (%p2660_p8), %s370_s19, 1024  }
  0x9e   : > { %1775 = vsyncadd (%p2660_p8), %s370_s19, 4294966272  ;;  %v424_v0 = vld [vmem:[%s2100_s14 + $0x8] sm:$0xff]  ;;  %v426_v1 = vld [vmem:[%s2100_s14 + $0x18] sm:$0xff]  ;;  %v1812_v17 = vmov 0.0   ;;  %s1449_s17 = sshll.u32 %s2088_s29, 4  ;;  %s1507_s23 = sshll.u32 %s1794_s24, 8 }
  0x9f   : > { %v432_v2 = vld [vmem:[%s2106_s20 + $0x8] sm:$0xff]  ;;  %v434_v3 = vld [vmem:[%s2106_s20 + $0x18] sm:$0xff]  ;;  %v448_v4 = vfloor.f32 %v424_v0  ;;  %v450_v5 = vfloor.f32 %v426_v1  ;;  %v2140_v47 = vld [vmem:[%s2092_s16] sm:$0xff]  ;;  %s416_s15 = scalar_lea.vmem [#allocation10], %s1449_s17  ;;  %s2569_s18 = scalar_lea.hbm %s2624_s6, %s1507_s23 }
  0xa0   : > { %v456_v6 = vfloor.f32 %v432_v2  ;;  %v458_v7 = vfloor.f32 %v434_v3  ;;  %v440_v33 = vld [vmem:[%s2109_s0 + $0x8] sm:$0xff]  ;;  %v442_v34 = vld [vmem:[%s2109_s0 + $0x18] sm:$0xff]  ;;  %v2152_v53 = vld [vmem:[%s2092_s16 + $0x80] sm:$0xff]  ;;  %v784_v63 = vunpack.c.h.bf16 %v2140_v47  ;;  %s1269_s1 = sshll.u32 %s416_s15, 4  ;;  %s1253_s24 = scalar_lea.sflag [#allocation4], %s2088_s29  ;;  %s2571_s1 = int_to_ptr.vmem [resolvable:$true] %s1269_s1 }
  0xa1   : > { %v464_v8 = vsub.f32 %v424_v0, %v448_v4  ;;  %v2119_v9 = vsub.f32 %v426_v1, %v450_v5  ;;  %vm496_vm0 = vcmp.ge.f32.partialorder %v448_v4, 0.0  ;;  %vm498_vm1 = vcmp.ge.f32.partialorder %v450_v5, 0.0  ;;  %v2143_v48 = vld [vmem:[%s2092_s16 + $0x8] sm:$0xff]  ;;  %v2162_v59 = vld [vmem:[%s2092_s16 + $0x100] sm:$0xff]  ;;  %s1712_s7 = scalar_lea.vmem %s2571_s1, 256  ;;  %p2668_p4 = scmp.ne.s32.totalorder %s2648_s10, 0 }
  0xa2   : > { %v472_v10 = vsub.f32 %v432_v2, %v456_v6  ;;  %v2121_v11 = vsub.f32 %v434_v3, %v458_v7  ;;  %vm504_vm2 = vcmp.le.f32.partialorder %v448_v4, 7.0  ;;  %vm506_vm3 = vcmp.le.f32.partialorder %v450_v5, 7.0  ;;  %v2155_v54 = vld [vmem:[%s2092_s16 + $0x88] sm:$0xff]  ;;  %v2170_v1 = vld [vmem:[%s2092_s16 + $0x180] sm:$0xff]  ;;  %p1713_p0 = scmp.ne.s32.totalorder %s2571_s1, %s1712_s7 }
  0xa3   : > { %v480_v12 = vsub.f32 1.0, %v464_v8  ;;  %v482_v13 = vsub.f32 1.0, %v2119_v9  ;;  %vm512_vm4 = vmand %vm496_vm0, %vm504_vm2  ;;  %v528_v15 = vadd.f32 1.0, %v448_v4  ;;  %v530_v19 = vadd.f32 1.0, %v450_v5  ;;  %v2165_v60 = vld [vmem:[%s2092_s16 + $0x108] sm:$0xff] }
  0xa4   : > { %v488_v14 = vsub.f32 1.0, %v472_v10  ;;  %v490_v16 = vsub.f32 1.0, %v2121_v11  ;;  %vm514_vm5 = vmand %vm498_vm1, %vm506_vm3  ;;  %v520_v18 = vsel %vm512_vm4, 1.0, %v1812_v17  ;;  %vm568_vm6 = vcmp.ge.f32.partialorder %v456_v6, 0.0  ;;  %v2173_v2 = vld [vmem:[%s2092_s16 + $0x188] sm:$0xff]  ;;  %p1714_p10 = pnand %p1713_p0, %p2668_p4 }
  0xa5   : > { %v522_v20 = vsel %vm514_vm5, 1.0, %v1812_v17  ;;  %vm536_vm7 = vcmp.ge.f32.partialorder %v528_v15, 0.0  ;;  %vm544_vm8 = vcmp.le.f32.partialorder %v528_v15, 7.0  ;;  %vm570_vm9 = vcmp.ge.f32.partialorder %v458_v7, 0.0 }
  0xa6   : > { %vm538_vm10 = vcmp.ge.f32.partialorder %v530_v19, 0.0  ;;  %vm546_vm11 = vcmp.le.f32.partialorder %v530_v19, 7.0  ;;  %vm552_vm12 = vmand %vm536_vm7, %vm544_vm8  ;;  %vm576_vm13 = vcmp.le.f32.partialorder %v456_v6, 7.0  ;;  %vm578_vm14 = vcmp.le.f32.partialorder %v458_v7, 7.0  ;;  %p1715_p13 = pneg %p1714_p10 }
  0xa7   : > { %vm554_vm15 = vmand %vm538_vm10, %vm546_vm11  ;;  %v560_v21 = vsel %vm552_vm12, 1.0, %v1812_v17  ;;  %v600_v22 = vadd.f32 1.0, %v456_v6  ;;  %v602_v23 = vadd.f32 1.0, %v458_v7  ;;  %v640_v24 = vmul.f32 %v488_v14, %v480_v12 }
  0xa8   : > { %v562_v25 = vsel %vm554_vm15, 1.0, %v1812_v17  ;;  %vm584_vm0 = vmand %vm568_vm6, %vm576_vm13  ;;  %v642_v26 = vmul.f32 %v490_v16, %v482_v13  ;;  %v672_v27 = vmul.f32 %v480_v12, %v472_v10  ;;  %v674_v28 = vmul.f32 %v482_v13, %v2121_v11 }
  0xa9   : > { %vm586_vm1 = vmand %vm570_vm9, %vm578_vm14  ;;  %v592_v29 = vsel %vm584_vm0, 1.0, %v1812_v17  ;;  %vm608_vm2 = vcmp.ge.f32.partialorder %v600_v22, 0.0  ;;  %vm610_vm3 = vcmp.ge.f32.partialorder %v602_v23, 0.0  ;;  %vm616_vm4 = vcmp.le.f32.partialorder %v600_v22, 7.0  ;;  %v431_v22 = vld [vmem:[%s2106_s20] sm:$0xff] }
  0xaa   : > { %v594_v30 = vsel %vm586_vm1, 1.0, %v1812_v17  ;;  %vm618_vm5 = vcmp.le.f32.partialorder %v602_v23, 7.0  ;;  %vm624_vm7 = vmand %vm608_vm2, %vm616_vm4  ;;  %v648_v31 = vmul.f32 %v640_v24, %v520_v18  ;;  %v650_v32 = vmul.f32 %v642_v26, %v522_v20  ;;  %v433_v23 = vld [vmem:[%s2106_s20 + $0x10] sm:$0xff] }
  0xab   : > { %vm626_vm6 = vmand %vm610_vm3, %vm618_vm5  ;;  %v632_v35 = vsel %vm624_vm7, 1.0, %v1812_v17  ;;  %v680_v36 = vmul.f32 %v672_v27, %v520_v18  ;;  %v682_v37 = vmul.f32 %v674_v28, %v522_v20  ;;  %v704_v38 = vmul.f32 %v488_v14, %v464_v8 }
  0xac   : > { %v634_v39 = vsel %vm626_vm6, 1.0, %v1812_v17  ;;  %v656_v40 = vmul.f32 %v648_v31, %v592_v29  ;;  %v658_v41 = vmul.f32 %v650_v32, %v594_v30  ;;  %v706_v42 = vmul.f32 %v490_v16, %v2119_v9  ;;  %v425_v16 = vld [vmem:[%s2100_s14 + $0x10] sm:$0xff] }
  0xad   : > { %v688_v43 = vmul.f32 %v680_v36, %v632_v35  ;;  %v690_v44 = vmul.f32 %v682_v37, %v634_v39  ;;  %v712_v45 = vmul.f32 %v704_v38, %v560_v21  ;;  %v736_v46 = vmul.f32 %v472_v10, %v464_v8 }
  0xae   : > { %v2145_v49 = vmul.f32 %v656_v40, %v440_v33  ;;  %v2147_v50 = vmul.f32 %v658_v41, %v442_v34  ;;  %v714_v51 = vmul.f32 %v706_v42, %v562_v25  ;;  %v738_v52 = vmul.f32 %v2121_v11, %v2119_v9  ;;  %v423_v11 = vld [vmem:[%s2100_s14] sm:$0xff] }
  0xaf   : > { %v2157_v55 = vmul.f32 %v688_v43, %v440_v33  ;;  %v2159_v56 = vmul.f32 %v690_v44, %v442_v34  ;;  %v720_v57 = vmul.f32 %v712_v45, %v592_v29  ;;  %v744_v58 = vmul.f32 %v736_v46, %v560_v21 }
  0xb0   : > { %v722_v61 = vmul.f32 %v714_v51, %v594_v30  ;;  %v746_v62 = vmul.f32 %v738_v52, %v562_v25  ;;  %v786_v0 = vunpack.c.h.bf16 %v2143_v48  ;;  %v833_v5 = vunpack.c.h.bf16 %v2152_v53 }
  0xb1   : > { %v2175_v3 = vmul.f32 %v720_v57, %v440_v33  ;;  %v752_v4 = vmul.f32 %v744_v58, %v632_v35  ;;  %v835_v6 = vunpack.c.h.bf16 %v2155_v54  ;;  %v882_v9 = vunpack.c.h.bf16 %v2162_v59 }
  0xb2   : > { %v2179_v7 = vmul.f32 %v722_v61, %v442_v34  ;;  %v754_v8 = vmul.f32 %v746_v62, %v634_v39  ;;  %v884_v10 = vunpack.c.h.bf16 %v2165_v60  ;;  %v931_v13 = vunpack.c.h.bf16 %v2170_v1 }
  0xb3   : > { %v2184_v12 = vmul.f32 %v752_v4, %v440_v33  ;;  %v933_v14 = vunpack.c.h.bf16 %v2173_v2  ;;  %v963_v15 = vmul.f32 %v784_v63, %v2145_v49  ;;  %v965_v19 = vmul.f32 %v786_v0, %v2147_v50 }
  0xb4   : > { %v2190_v18 = vmul.f32 %v754_v8, %v442_v34  ;;  %v995_v20 = vmul.f32 %v833_v5, %v2157_v55  ;;  %v997_v21 = vmul.f32 %v835_v6, %v2159_v56  ;;  %v1059_v24 = vmul.f32 %v882_v9, %v2175_v3 }
  0xb5   : > { %v1061_v25 = vmul.f32 %v884_v10, %v2179_v7  ;;  %v1123_v26 = vmul.f32 %v931_v13, %v2184_v12  ;;  %v447_v27 = vfloor.f32 %v423_v11  ;;  %v449_v31 = vfloor.f32 %v425_v16  ;;  %v439_v10 = vld [vmem:[%s2109_s0] sm:$0xff] }
  0xb6   : > { %v1027_v28 = vadd.f32 %v995_v20, %v963_v15  ;;  %v1029_v29 = vadd.f32 %v997_v21, %v965_v19  ;;  %v1125_v30 = vmul.f32 %v933_v14, %v2190_v18  ;;  %v455_v32 = vfloor.f32 %v431_v22 }
  0xb7   : > { %v457_v33 = vfloor.f32 %v433_v23  ;;  %v2201_v34 = vsub.f32 %v423_v11, %v447_v27  ;;  %vm495_vm8 = vcmp.ge.f32.partialorder %v447_v27, 0.0  ;;  %v2203_v37 = vsub.f32 %v425_v16, %v449_v31  ;;  %v441_v16 = vld [vmem:[%s2109_s0 + $0x10] sm:$0xff] }
  0xb8   : > { %v1091_v35 = vadd.f32 %v1059_v24, %v1027_v28  ;;  %v1093_v36 = vadd.f32 %v1061_v25, %v1029_v29  ;;  %vm497_vm9 = vcmp.ge.f32.partialorder %v449_v31, 0.0  ;;  %v471_v38 = vsub.f32 %v431_v22, %v455_v32 }
  0xb9   : > { %v2205_v39 = vsub.f32 %v433_v23, %v457_v33  ;;  %v479_v40 = vsub.f32 1.0, %v2201_v34  ;;  %vm503_vm10 = vcmp.le.f32.partialorder %v447_v27, 7.0  ;;  %v481_v43 = vsub.f32 1.0, %v2203_v37 }
  0xba   : > { %v1155_v41 = vadd.f32 %v1123_v26, %v1091_v35  ;;  %v1157_v42 = vadd.f32 %v1125_v30, %v1093_v36  ;;  %vm505_vm11 = vcmp.le.f32.partialorder %v449_v31, 7.0  ;;  %vm511_vm12 = vmand %vm495_vm8, %vm503_vm10  ;;  %v487_v44 = vsub.f32 1.0, %v471_v38 }
  0xbb   : > { %v489_v45 = vsub.f32 1.0, %v2205_v39  ;;  %vm513_vm13 = vmand %vm497_vm9, %vm505_vm11  ;;  %v519_v46 = vsel %vm511_vm12, 1.0, %v1812_v17  ;;  %v527_v51 = vadd.f32 1.0, %v447_v27  ;;  %v529_v58 = vadd.f32 1.0, %v449_v31 }
  0xbc   : > { %v1187_v52 = vpack.c.bf16 %v1157_v42, %v1155_v41  ;;  %v521_v57 = vsel %vm513_vm13, 1.0, %v1812_v17  ;;  %vm567_vm14 = vcmp.ge.f32.partialorder %v455_v32, 0.0  ;;  %vm569_vm1 = vcmp.ge.f32.partialorder %v457_v33, 0.0 }
  0xbd   : > { %vm535_vm15 = vcmp.ge.f32.partialorder %v527_v51, 0.0  ;;  %vm543_vm0 = vcmp.le.f32.partialorder %v527_v51, 7.0  ;;  %vm575_vm2 = vcmp.le.f32.partialorder %v455_v32, 7.0  ;;  %vm537_vm3 = vcmp.ge.f32.partialorder %v529_v58, 0.0 }
  0xbe   : > { %1209 = vmatprep.subr.bf16.mxu0 %v1187_v52  ;;  %vm545_vm4 = vcmp.le.f32.partialorder %v529_v58, 7.0  ;;  %vm551_vm5 = vmand %vm535_vm15, %vm543_vm0  ;;  %vm577_vm7 = vcmp.le.f32.partialorder %v457_v33, 7.0  ;;  %v599_v61 = vadd.f32 1.0, %v455_v32  ;;  %v601_v63 = vadd.f32 1.0, %v457_v33  ;;  %v428_v58 = vld [vmem:[%s2100_s14 + $0x28] sm:$0xff] }
  0xbf   : > { %vm553_vm6 = vmand %vm537_vm3, %vm545_vm4  ;;  %v559_v62 = vsel %vm551_vm5, 1.0, %v1812_v17  ;;  %v639_v0 = vmul.f32 %v487_v44, %v479_v40  ;;  %v641_v4 = vmul.f32 %v489_v45, %v481_v43  ;;  %v671_v6 = vmul.f32 %v479_v40, %v471_v38 }
  0xc0   : > { %v561_v5 = vsel %vm553_vm6, 1.0, %v1812_v17  ;;  %vm583_vm8 = vmand %vm567_vm14, %vm575_vm2  ;;  %vm607_vm9 = vcmp.ge.f32.partialorder %v599_v61, 0.0  ;;  %vm615_vm10 = vcmp.le.f32.partialorder %v599_v61, 7.0  ;;  %vm609_vm12 = vcmp.ge.f32.partialorder %v601_v63, 0.0 }
  0xc1   : > { %vm585_vm11 = vmand %vm569_vm1, %vm577_vm7  ;;  %v591_v8 = vsel %vm583_vm8, 1.0, %v1812_v17  ;;  %vm617_vm13 = vcmp.le.f32.partialorder %v601_v63, 7.0  ;;  %v647_v9 = vmul.f32 %v639_v0, %v519_v46  ;;  %v649_v13 = vmul.f32 %v641_v4, %v521_v57  ;;  %v436_v0 = vld [vmem:[%s2106_s20 + $0x28] sm:$0xff] }
  0xc2   : > { %v593_v11 = vsel %vm585_vm11, 1.0, %v1812_v17  ;;  %vm623_vm15 = vmand %vm607_vm9, %vm615_vm10  ;;  %v673_v14 = vmul.f32 %v481_v43, %v2205_v39  ;;  %v679_v15 = vmul.f32 %v671_v6, %v519_v46  ;;  %v703_v21 = vmul.f32 %v487_v44, %v2201_v34 }
  0xc3   : > { %vm625_vm14 = vmand %vm609_vm12, %vm617_vm13  ;;  %v631_v19 = vsel %vm623_vm15, 1.0, %v1812_v17  ;;  %v655_v20 = vmul.f32 %v647_v9, %v591_v8  ;;  %v705_v22 = vmul.f32 %v489_v45, %v2203_v37  ;;  %v657_v24 = vmul.f32 %v649_v13, %v593_v11 }
  0xc4   : > { %v633_v23 = vsel %vm625_vm14, 1.0, %v1812_v17  ;;  %v681_v25 = vmul.f32 %v673_v14, %v521_v57  ;;  %v687_v26 = vmul.f32 %v679_v15, %v631_v19  ;;  %v711_v28 = vmul.f32 %v703_v21, %v559_v62 }
  0xc5   : > { %v2225_v27 = vmul.f32 %v655_v20, %v439_v10  ;;  %v713_v29 = vmul.f32 %v705_v22, %v561_v5  ;;  %v735_v30 = vmul.f32 %v471_v38, %v2201_v34  ;;  %v2228_v31 = vmul.f32 %v657_v24, %v441_v16 }
  0xc6   : > { %v689_v32 = vmul.f32 %v681_v25, %v633_v23  ;;  %v2230_v33 = vmul.f32 %v687_v26, %v439_v10  ;;  %v737_v35 = vmul.f32 %v2205_v39, %v2203_v37  ;;  %v719_v36 = vmul.f32 %v711_v28, %v591_v8 }
  0xc7   : > { %v721_v40 = vmul.f32 %v713_v29, %v593_v11  ;;  %v743_v41 = vmul.f32 %v735_v30, %v559_v62  ;;  %v783_v42 = vunpack.c.l.bf16 %v2140_v47  ;;  %v785_v34 = vunpack.c.l.bf16 %v2143_v48  ;;  %v430_v48 = vld [vmem:[%s2100_s14 + $0x38] sm:$0xff] }
  0xc8   : > { %v2235_v43 = vmul.f32 %v689_v32, %v441_v16  ;;  %v745_v44 = vmul.f32 %v737_v35, %v561_v5  ;;  %v832_v38 = vunpack.c.l.bf16 %v2152_v53  ;;  %v2239_v45 = vmul.f32 %v719_v36, %v439_v10 }
  0xc9   : > { %v2241_v46 = vmul.f32 %v721_v40, %v441_v16  ;;  %v751_v37 = vmul.f32 %v743_v41, %v631_v19  ;;  %v834_v39 = vunpack.c.l.bf16 %v2155_v54  ;;  %v881_v52 = vunpack.c.l.bf16 %v2162_v59 }
  0xca   : > { %v753_v51 = vmul.f32 %v745_v44, %v633_v23  ;;  %v883_v47 = vunpack.c.l.bf16 %v2165_v60  ;;  %v930_v57 = vunpack.c.l.bf16 %v2170_v1  ;;  %v932_v53 = vunpack.c.l.bf16 %v2173_v2  ;;  %v438_v1 = vld [vmem:[%s2106_s20 + $0x38] sm:$0xff] }
  0xcb   : > { %v2249_v61 = vmul.f32 %v751_v37, %v439_v10  ;;  %v962_v62 = vmul.f32 %v783_v42, %v2225_v27  ;;  %v964_v63 = vmul.f32 %v785_v34, %v2228_v31  ;;  %v994_v4 = vmul.f32 %v832_v38, %v2230_v33 }
  0xcc   : > { %v2255_v54 = vmul.f32 %v753_v51, %v441_v16  ;;  %v996_v59 = vmul.f32 %v834_v39, %v2235_v43  ;;  %v1058_v60 = vmul.f32 %v881_v52, %v2239_v45  ;;  %v1060_v5 = vmul.f32 %v883_v47, %v2241_v46 }
  0xcd   : > { %v1122_v6 = vmul.f32 %v930_v57, %v2249_v61  ;;  %v452_v8 = vfloor.f32 %v428_v58  ;;  %v454_v2 = vfloor.f32 %v430_v48  ;;  %v1026_v9 = vadd.f32 %v994_v4, %v962_v62  ;;  %v444_v57 = vld [vmem:[%s2109_s0 + $0x28] sm:$0xff] }
  0xce   : > { %v1028_v10 = vadd.f32 %v996_v59, %v964_v63  ;;  %v1124_v11 = vmul.f32 %v932_v53, %v2255_v54  ;;  %v460_v13 = vfloor.f32 %v436_v0  ;;  %v462_v14 = vfloor.f32 %v438_v1 }
  0xcf   : > { %v2264_v15 = vsub.f32 %v428_v58, %v452_v8  ;;  %v2266_v16 = vsub.f32 %v430_v48, %v454_v2  ;;  %vm500_vm0 = vcmp.ge.f32.partialorder %v452_v8, 0.0  ;;  %v1090_v19 = vadd.f32 %v1058_v60, %v1026_v9  ;;  %v446_v58 = vld [vmem:[%s2109_s0 + $0x38] sm:$0xff] }
  0xd0   : > { %v1092_v20 = vadd.f32 %v1060_v5, %v1028_v10  ;;  %v2268_v21 = vsub.f32 %v436_v0, %v460_v13  ;;  %vm502_vm1 = vcmp.ge.f32.partialorder %v454_v2, 0.0  ;;  %v2270_v22 = vsub.f32 %v438_v1, %v462_v14  ;;  %v2296_v9 = vld [vmem:[%s2092_s16 + $0x18] sm:$0xff] }
  0xd1   : > { %v484_v23 = vsub.f32 1.0, %v2264_v15  ;;  %v486_v24 = vsub.f32 1.0, %v2266_v16  ;;  %vm508_vm2 = vcmp.le.f32.partialorder %v452_v8, 7.0  ;;  %v1154_v25 = vadd.f32 %v1122_v6, %v1090_v19  ;;  %v2305_v19 = vld [vmem:[%s2092_s16 + $0x90] sm:$0xff] }
  0xd2   : > { %v1156_v26 = vadd.f32 %v1124_v11, %v1092_v20  ;;  %v492_v28 = vsub.f32 1.0, %v2268_v21  ;;  %vm510_vm3 = vcmp.le.f32.partialorder %v454_v2, 7.0  ;;  %vm516_vm4 = vmand %vm500_vm0, %vm508_vm2  ;;  %v494_v29 = vsub.f32 1.0, %v2270_v22 }
  0xd3   : > { %vm518_vm5 = vmand %vm502_vm1, %vm510_vm3  ;;  %v524_v30 = vsel %vm516_vm4, 1.0, %v1812_v17  ;;  %v532_v32 = vadd.f32 1.0, %v452_v8  ;;  %v534_v35 = vadd.f32 1.0, %v454_v2  ;;  %vm572_vm7 = vcmp.ge.f32.partialorder %v460_v13, 0.0  ;;  %v2293_v2 = vld [vmem:[%s2092_s16 + $0x10] sm:$0xff] }
  0xd4   : > { %v1186_v36 = vpack.c.bf16 %v1156_v26, %v1154_v25  ;;  %v526_v40 = vsel %vm518_vm5, 1.0, %v1812_v17  ;;  %vm574_vm6 = vcmp.ge.f32.partialorder %v462_v14, 0.0  ;;  %vm580_vm13 = vcmp.le.f32.partialorder %v460_v13, 7.0  ;;  %v2312_v26 = vld [vmem:[%s2092_s16 + $0x98] sm:$0xff] }
  0xd5   : > { %vm540_vm8 = vcmp.ge.f32.partialorder %v532_v32, 0.0  ;;  %vm542_vm9 = vcmp.ge.f32.partialorder %v534_v35, 0.0  ;;  %vm548_vm10 = vcmp.le.f32.partialorder %v532_v32, 7.0  ;;  %vm550_vm11 = vcmp.le.f32.partialorder %v534_v35, 7.0  ;;  %vm588_vm0 = vmand %vm572_vm7, %vm580_vm13 }
  0xd6   : > { %1210 = vmatpush1.bf16.msra.mxu0 %v1186_v36  ;;  %vm556_vm12 = vmand %vm540_vm8, %vm548_vm10  ;;  %vm582_vm15 = vcmp.le.f32.partialorder %v462_v14, 7.0  ;;  %v604_v41 = vadd.f32 1.0, %v460_v13  ;;  %v606_v42 = vadd.f32 1.0, %v462_v14  ;;  %v644_v34 = vmul.f32 %v492_v28, %v484_v23  ;;  %v2326_v36 = vld [vmem:[%s2092_s16 + $0x198] sm:$0xff] }
  0xd7   : > { %vm558_vm14 = vmand %vm542_vm9, %vm550_vm11  ;;  %v564_v44 = vsel %vm556_vm12, 1.0, %v1812_v17  ;;  %v646_v38 = vmul.f32 %v494_v29, %v486_v24  ;;  %v676_v37 = vmul.f32 %v484_v23, %v2268_v21  ;;  %v596_v51 = vsel %vm588_vm0, 1.0, %v1812_v17 }
  0xd8   : > { %v566_v39 = vsel %vm558_vm14, 1.0, %v1812_v17  ;;  %vm612_vm1 = vcmp.ge.f32.partialorder %v604_v41, 0.0  ;;  %vm614_vm2 = vcmp.ge.f32.partialorder %v606_v42, 0.0  ;;  %vm620_vm3 = vcmp.le.f32.partialorder %v604_v41, 7.0  ;;  %vm590_vm4 = vmand %vm574_vm6, %vm582_vm15 }
  0xd9   : > { %vm622_vm5 = vcmp.le.f32.partialorder %v606_v42, 7.0  ;;  %v652_v52 = vmul.f32 %v644_v34, %v524_v30  ;;  %v654_v47 = vmul.f32 %v646_v38, %v526_v40  ;;  %v598_v48 = vsel %vm590_vm4, 1.0, %v1812_v17  ;;  %vm628_vm8 = vmand %vm612_vm1, %vm620_vm3 }
  0xda   : > { %v678_v53 = vmul.f32 %v486_v24, %v2270_v22  ;;  %v684_v62 = vmul.f32 %v676_v37, %v524_v30  ;;  %v708_v63 = vmul.f32 %v492_v28, %v2264_v15  ;;  %vm630_vm7 = vmand %vm614_vm2, %vm622_vm5  ;;  %v636_v0 = vsel %vm628_vm8, 1.0, %v1812_v17  ;;  %v2315_v28 = vld [vmem:[%s2092_s16 + $0x110] sm:$0xff] }
  0xdb   : > { %v660_v4 = vmul.f32 %v652_v52, %v596_v51  ;;  %v662_v59 = vmul.f32 %v654_v47, %v598_v48  ;;  %v710_v60 = vmul.f32 %v494_v29, %v2266_v16  ;;  %v638_v1 = vsel %vm630_vm7, 1.0, %v1812_v17 }
  0xdc   : > { %v686_v5 = vmul.f32 %v678_v53, %v526_v40  ;;  %v692_v6 = vmul.f32 %v684_v62, %v636_v0  ;;  %v716_v8 = vmul.f32 %v708_v63, %v564_v44  ;;  %v740_v14 = vmul.f32 %v2268_v21, %v2264_v15  ;;  %v2320_v15 = vld [vmem:[%s2092_s16 + $0x118] sm:$0xff]  ;;  %v2323_v21 = vld [vmem:[%s2092_s16 + $0x190] sm:$0xff] }
  0xdd   : > { %v2298_v10 = vmul.f32 %v660_v4, %v444_v57  ;;  %v2300_v11 = vmul.f32 %v662_v59, %v446_v58  ;;  %v718_v13 = vmul.f32 %v710_v60, %v566_v39  ;;  %v742_v25 = vmul.f32 %v2270_v22, %v2266_v16  ;;  %v435_v4 = vld [vmem:[%s2106_s20 + $0x20] sm:$0xff]  ;;  %v437_v59 = vld [vmem:[%s2106_s20 + $0x30] sm:$0xff] }
  0xde   : > { %v694_v20 = vmul.f32 %v686_v5, %v638_v1  ;;  %v2307_v23 = vmul.f32 %v692_v6, %v444_v57  ;;  %v724_v24 = vmul.f32 %v716_v8, %v596_v51  ;;  %v748_v30 = vmul.f32 %v740_v14, %v564_v44 }
  0xdf   : > { %v726_v29 = vmul.f32 %v718_v13, %v598_v48  ;;  %v788_v32 = vunpack.c.h.bf16 %v2293_v2  ;;  %v790_v35 = vunpack.c.h.bf16 %v2296_v9  ;;  %v750_v22 = vmul.f32 %v742_v25, %v566_v39  ;;  %v427_v48 = vld [vmem:[%s2100_s14 + $0x20] sm:$0xff]  ;;  %v429_v39 = vld [vmem:[%s2100_s14 + $0x30] sm:$0xff] }
  0xe0   : > { %v2328_v40 = vmul.f32 %v694_v20, %v446_v58  ;;  %v2330_v16 = vmul.f32 %v724_v24, %v444_v57  ;;  %v837_v41 = vunpack.c.h.bf16 %v2305_v19  ;;  %v756_v44 = vmul.f32 %v748_v30, %v636_v0 }
  0xe1   : > { %v2333_v42 = vmul.f32 %v726_v29, %v446_v58  ;;  %v839_v34 = vunpack.c.h.bf16 %v2312_v26  ;;  %v886_v38 = vunpack.c.h.bf16 %v2315_v28  ;;  %v758_v37 = vmul.f32 %v750_v22, %v638_v1 }
  0xe2   : > { %v888_v51 = vunpack.c.h.bf16 %v2320_v15  ;;  %v935_v52 = vunpack.c.h.bf16 %v2323_v21  ;;  %v937_v47 = vunpack.c.h.bf16 %v2326_v36  ;;  %v2342_v53 = vmul.f32 %v756_v44, %v444_v57 }
  0xe3   : > { %v967_v62 = vmul.f32 %v788_v32, %v2298_v10  ;;  %v969_v63 = vmul.f32 %v790_v35, %v2300_v11  ;;  %v999_v0 = vmul.f32 %v837_v41, %v2307_v23  ;;  %v2349_v60 = vmul.f32 %v758_v37, %v446_v58 }
  0xe4   : > { %2661 = vst [vmem:[#allocation20_spill] sm:$0xff] %v2342_v53  ;;  %v1001_v1 = vmul.f32 %v839_v34, %v2328_v40  ;;  %v1063_v5 = vmul.f32 %v886_v38, %v2330_v16  ;;  %v1065_v6 = vmul.f32 %v888_v51, %v2333_v42  ;;  %v1127_v57 = vmul.f32 %v935_v52, %v2342_v53 }
  0xe5   : > { %2662 = vst [vmem:[#allocation21_spill] sm:$0xff] %v2349_v60  ;;  %v1031_v8 = vadd.f32 %v999_v0, %v967_v62  ;;  %v451_v13 = vfloor.f32 %v427_v48  ;;  %v453_v14 = vfloor.f32 %v429_v39  ;;  %v1129_v24 = vmul.f32 %v937_v47, %v2349_v60 }
  0xe6   : > { %v1033_v20 = vadd.f32 %v1001_v1, %v969_v63  ;;  %v459_v25 = vfloor.f32 %v435_v4  ;;  %v461_v29 = vfloor.f32 %v437_v59 }
  0xe7   : > { %v1095_v30 = vadd.f32 %v1063_v5, %v1031_v8  ;;  %v2356_v32 = vsub.f32 %v427_v48, %v451_v13  ;;  %v2358_v58 = vsub.f32 %v429_v39, %v453_v14  ;;  %vm499_vm6 = vcmp.ge.f32.partialorder %v451_v13, 0.0 }
  0xe8   : > { %v1097_v35 = vadd.f32 %v1065_v6, %v1033_v20  ;;  %v475_v22 = vsub.f32 %v435_v4, %v459_v25  ;;  %v2360_v41 = vsub.f32 %v437_v59, %v461_v29  ;;  %vm501_vm9 = vcmp.ge.f32.partialorder %v453_v14, 0.0 }
  0xe9   : > { %v1159_v44 = vadd.f32 %v1127_v57, %v1095_v30  ;;  %v483_v34 = vsub.f32 1.0, %v2356_v32  ;;  %v485_v38 = vsub.f32 1.0, %v2358_v58  ;;  %vm507_vm10 = vcmp.le.f32.partialorder %v451_v13, 7.0 }
  0xea   : > { %v1161_v37 = vadd.f32 %v1129_v24, %v1097_v35  ;;  %v491_v51 = vsub.f32 1.0, %v475_v22  ;;  %v493_v52 = vsub.f32 1.0, %v2360_v41  ;;  %vm509_vm11 = vcmp.le.f32.partialorder %v453_v14, 7.0  ;;  %vm515_vm12 = vmand %vm499_vm6, %vm507_vm10  ;;  %v443_v24 = vld [vmem:[%s2109_s0 + $0x20] sm:$0xff] }
  0xeb   : > { %vm517_vm13 = vmand %vm501_vm9, %vm509_vm11  ;;  %v523_v47 = vsel %vm515_vm12, 1.0, %v1812_v17  ;;  %v531_v48 = vadd.f32 1.0, %v451_v13  ;;  %v533_v39 = vadd.f32 1.0, %v453_v14  ;;  %vm571_vm15 = vcmp.ge.f32.partialorder %v459_v25, 0.0 }
  0xec   : > { %v1189_v62 = vpack.c.bf16 %v1161_v37, %v1159_v44  ;;  %v525_v63 = vsel %vm517_vm13, 1.0, %v1812_v17  ;;  %vm573_vm14 = vcmp.ge.f32.partialorder %v461_v29, 0.0  ;;  %vm579_vm0 = vcmp.le.f32.partialorder %v459_v25, 7.0 }
  0xed   : > { %vm539_vm1 = vcmp.ge.f32.partialorder %v531_v48, 0.0  ;;  %vm541_vm2 = vcmp.ge.f32.partialorder %v533_v39, 0.0  ;;  %vm547_vm3 = vcmp.le.f32.partialorder %v531_v48, 7.0  ;;  %vm549_vm4 = vcmp.le.f32.partialorder %v533_v39, 7.0  ;;  %vm587_vm5 = vmand %vm571_vm15, %vm579_vm0 }
  0xee   : > { %1211 = vmatprep.subr.bf16.mxu0 %v1189_v62  ;;  %vm555_vm8 = vmand %vm539_vm1, %vm547_vm3  ;;  %vm581_vm7 = vcmp.le.f32.partialorder %v461_v29, 7.0  ;;  %v595_v0 = vsel %vm587_vm5, 1.0, %v1812_v17  ;;  %v603_v4 = vadd.f32 1.0, %v459_v25  ;;  %v605_v59 = vadd.f32 1.0, %v461_v29  ;;  %v445_v25 = vld [vmem:[%s2109_s0 + $0x30] sm:$0xff] }
  0xef   : > { %vm557_vm6 = vmand %vm541_vm2, %vm549_vm4  ;;  %v563_v1 = vsel %vm555_vm8, 1.0, %v1812_v17  ;;  %v643_v5 = vmul.f32 %v491_v51, %v483_v34  ;;  %v645_v6 = vmul.f32 %v493_v52, %v485_v38  ;;  %v675_v8 = vmul.f32 %v483_v34, %v475_v22 }
  0xf0   : > { %v565_v57 = vsel %vm557_vm6, 1.0, %v1812_v17  ;;  %vm589_vm9 = vmand %vm573_vm14, %vm581_vm7  ;;  %vm611_vm10 = vcmp.ge.f32.partialorder %v603_v4, 0.0  ;;  %vm613_vm11 = vcmp.ge.f32.partialorder %v605_v59, 0.0  ;;  %vm619_vm12 = vcmp.le.f32.partialorder %v603_v4, 7.0 }
  0xf1   : > { %v597_v13 = vsel %vm589_vm9, 1.0, %v1812_v17  ;;  %vm621_vm13 = vcmp.le.f32.partialorder %v605_v59, 7.0  ;;  %vm627_vm15 = vmand %vm611_vm10, %vm619_vm12  ;;  %v651_v14 = vmul.f32 %v643_v5, %v523_v47  ;;  %v653_v20 = vmul.f32 %v645_v6, %v525_v63 }
  0xf2   : > { %vm629_vm0 = vmand %vm613_vm11, %vm621_vm13  ;;  %v635_v30 = vsel %vm627_vm15, 1.0, %v1812_v17  ;;  %v677_v35 = vmul.f32 %v485_v38, %v2360_v41  ;;  %v683_v44 = vmul.f32 %v675_v8, %v523_v47  ;;  %v707_v29 = vmul.f32 %v491_v51, %v2356_v32 }
  0xf3   : > { %v637_v34 = vsel %vm629_vm0, 1.0, %v1812_v17  ;;  %v659_v37 = vmul.f32 %v651_v14, %v595_v0  ;;  %v661_v48 = vmul.f32 %v653_v20, %v597_v13  ;;  %v709_v39 = vmul.f32 %v493_v52, %v2358_v58 }
  0xf4   : > { %v685_v62 = vmul.f32 %v677_v35, %v525_v63  ;;  %v691_v4 = vmul.f32 %v683_v44, %v635_v30  ;;  %v715_v59 = vmul.f32 %v707_v29, %v563_v1  ;;  %v739_v5 = vmul.f32 %v475_v22, %v2356_v32 }
  0xf5   : > { %v2380_v6 = vmul.f32 %v659_v37, %v443_v24  ;;  %v2382_v60 = vmul.f32 %v661_v48, %v445_v25  ;;  %v717_v53 = vmul.f32 %v709_v39, %v565_v57  ;;  %v741_v38 = vmul.f32 %v2360_v41, %v2358_v58  ;;  %v1471_v39 = vld [vmem:[%s2092_s16 + $0x128] sm:$0xff] }
  0xf6   : > { %v693_v51 = vmul.f32 %v685_v62, %v637_v34  ;;  %v2386_v47 = vmul.f32 %v691_v4, %v443_v24  ;;  %v723_v17 = vmul.f32 %v715_v59, %v595_v0  ;;  %v747_v8 = vmul.f32 %v739_v5, %v563_v1  ;;  %v1487_v62 = vld [vmem:[%s2092_s16 + $0x1a8] sm:$0xff] }
  0xf7   : > { %v725_v14 = vmul.f32 %v717_v53, %v597_v13  ;;  %v749_v52 = vmul.f32 %v741_v38, %v565_v57  ;;  %v787_v63 = vunpack.c.l.bf16 %v2293_v2  ;;  %v789_v32 = vunpack.c.l.bf16 %v2296_v9 }
  0xf8   : > { %v2390_v22 = vmul.f32 %v693_v51, %v445_v25  ;;  %v2392_v20 = vmul.f32 %v723_v17, %v443_v24  ;;  %v755_v35 = vmul.f32 %v747_v8, %v635_v30  ;;  %v836_v58 = vunpack.c.l.bf16 %v2305_v19  ;;  %v771_v19 = vld [vmem:[%s2092_s16 + $0x20] sm:$0xff]  ;;  %v772_v30 = vld [vmem:[%s2092_s16 + $0x28] sm:$0xff] }
  0xf9   : > { %v2395_v41 = vmul.f32 %v725_v14, %v445_v25  ;;  %v757_v53 = vmul.f32 %v749_v52, %v637_v34  ;;  %v838_v0 = vunpack.c.l.bf16 %v2312_v26  ;;  %v885_v1 = vunpack.c.l.bf16 %v2315_v28  ;;  %v1455_v34 = vld [vmem:[%s2092_s16 + $0xa8] sm:$0xff] }
  0xfa   : > { %v2399_v2 = vmul.f32 %v755_v35, %v443_v24  ;;  %v887_v9 = vunpack.c.l.bf16 %v2320_v15  ;;  %v934_v57 = vunpack.c.l.bf16 %v2323_v21  ;;  %v936_v13 = vunpack.c.l.bf16 %v2326_v36  ;;  %v1454_v24 = vld [vmem:[%s2092_s16 + $0xa0] sm:$0xff] }
  0xfb   : > { %2663 = vst [vmem:[#allocation22_spill] sm:$0xff] %v2395_v41  ;;  %v2406_v44 = vmul.f32 %v757_v53, %v445_v25  ;;  %v966_v29 = vmul.f32 %v787_v63, %v2380_v6  ;;  %v968_v26 = vmul.f32 %v789_v32, %v2382_v60  ;;  %v998_v28 = vmul.f32 %v836_v58, %v2386_v47  ;;  %v1470_v15 = vld [vmem:[%s2092_s16 + $0x120] sm:$0xff] }
  0xfc   : > { %v1000_v37 = vmul.f32 %v838_v0, %v2390_v22  ;;  %v1062_v21 = vmul.f32 %v885_v1, %v2392_v20  ;;  %v1064_v36 = vmul.f32 %v887_v9, %v2395_v41  ;;  %v1126_v48 = vmul.f32 %v934_v57, %v2399_v2  ;;  %v1486_v25 = vld [vmem:[%s2092_s16 + $0x1a0] sm:$0xff] }
  0xfd   : > { %v1030_v4 = vadd.f32 %v998_v28, %v966_v29  ;;  %v1128_v59 = vmul.f32 %v936_v13, %v2406_v44  ;;  %v792_v5 = vunpack.c.h.bf16 %v771_v19  ;;  %v794_v38 = vunpack.c.h.bf16 %v772_v30 }
  0xfe   : > { %v1032_v51 = vadd.f32 %v1000_v37, %v968_v26  ;;  %v841_v17 = vunpack.c.h.bf16 %v1454_v24  ;;  %v843_v8 = vunpack.c.h.bf16 %v1455_v34  ;;  %v890_v14 = vunpack.c.h.bf16 %v1470_v15 }
  0xff   : > { %v1094_v52 = vadd.f32 %v1062_v21, %v1030_v4  ;;  %v892_v63 = vunpack.c.h.bf16 %v1471_v39  ;;  %v939_v32 = vunpack.c.h.bf16 %v1486_v25  ;;  %v941_v35 = vunpack.c.h.bf16 %v1487_v62 }
 0x100   : > { %v1096_v58 = vadd.f32 %v1064_v36, %v1032_v51  ;;  %v971_v53 = vmul.f32 %v792_v5, %v2145_v49  ;;  %v973_v0 = vmul.f32 %v794_v38, %v2147_v50  ;;  %v1003_v1 = vmul.f32 %v841_v17, %v2157_v55 }
 0x101   : > { %v1158_v9 = vadd.f32 %v1126_v48, %v1094_v52  ;;  %v1005_v57 = vmul.f32 %v843_v8, %v2159_v56  ;;  %v1067_v13 = vmul.f32 %v890_v14, %v2175_v3  ;;  %v1069_v29 = vmul.f32 %v892_v63, %v2179_v7 }
 0x102   : > { %v1160_v26 = vadd.f32 %v1128_v59, %v1096_v58  ;;  %v1035_v28 = vadd.f32 %v1003_v1, %v971_v53  ;;  %v1131_v37 = vmul.f32 %v939_v32, %v2184_v12  ;;  %v1133_v21 = vmul.f32 %v941_v35, %v2190_v18  ;;  %v773_v32 = vld [vmem:[%s2092_s16 + $0x30] sm:$0xff]  ;;  %v1457_v53 = vld [vmem:[%s2092_s16 + $0xb8] sm:$0xff] }
 0x103   : > { %v1037_v36 = vadd.f32 %v1005_v57, %v973_v0  ;;  %v791_v4 = vunpack.c.l.bf16 %v771_v19  ;;  %v793_v5 = vunpack.c.l.bf16 %v772_v30  ;;  %v840_v38 = vunpack.c.l.bf16 %v1454_v24  ;;  %v1472_v0 = vld [vmem:[%s2092_s16 + $0x130] sm:$0xff]  ;;  %v1473_v1 = vld [vmem:[%s2092_s16 + $0x138] sm:$0xff] }
 0x104   : > { %v1188_v48 = vpack.c.bf16 %v1160_v26, %v1158_v9  ;;  %v1099_v51 = vadd.f32 %v1067_v13, %v1035_v28  ;;  %v842_v17 = vunpack.c.l.bf16 %v1455_v34  ;;  %v889_v8 = vunpack.c.l.bf16 %v1470_v15  ;;  %v774_v34 = vld [vmem:[%s2092_s16 + $0x38] sm:$0xff]  ;;  %v1456_v15 = vld [vmem:[%s2092_s16 + $0xb0] sm:$0xff] }
 0x105   : > { %v1101_v14 = vadd.f32 %v1069_v29, %v1037_v36  ;;  %v891_v52 = vunpack.c.l.bf16 %v1471_v39  ;;  %v938_v59 = vunpack.c.l.bf16 %v1486_v25  ;;  %v940_v63 = vunpack.c.l.bf16 %v1487_v62  ;;  %v1488_v26 = vld [vmem:[%s2092_s16 + $0x1b0] sm:$0xff]  ;;  %v1489_v28 = vld [vmem:[%s2092_s16 + $0x1b8] sm:$0xff] }
 0x106   : > { %1212 = vmatpush1.bf16.msra.mxu0 %v1188_v48  ;;  %v1163_v35 = vadd.f32 %v1131_v37, %v1099_v51  ;;  %v970_v19 = vmul.f32 %v791_v4, %v2225_v27  ;;  %v972_v30 = vmul.f32 %v793_v5, %v2228_v31  ;;  %v1002_v24 = vmul.f32 %v840_v38, %v2230_v33 }
 0x107   : > { %v1165_v58 = vadd.f32 %v1133_v21, %v1101_v14  ;;  %v1004_v39 = vmul.f32 %v842_v17, %v2235_v43  ;;  %v1066_v25 = vmul.f32 %v889_v8, %v2239_v45  ;;  %v1068_v62 = vmul.f32 %v891_v52, %v2241_v46 }
 0x108   : > { %v1034_v9 = vadd.f32 %v1002_v24, %v970_v19  ;;  %v1130_v57 = vmul.f32 %v938_v59, %v2249_v61  ;;  %v1132_v13 = vmul.f32 %v940_v63, %v2255_v54  ;;  %v796_v29 = vunpack.c.h.bf16 %v773_v32 }
 0x109   : > { %v1191_v37 = vpack.c.bf16 %v1165_v58, %v1163_v35  ;;  %v1036_v36 = vadd.f32 %v1004_v39, %v972_v30  ;;  %v798_v21 = vunpack.c.h.bf16 %v774_v34  ;;  %v845_v4 = vunpack.c.h.bf16 %v1456_v15  ;;  %v2664_v39 = vld [vmem:[#allocation20_spill] sm:$0xff] }
 0x10a   : > { %v1098_v5 = vadd.f32 %v1066_v25, %v1034_v9  ;;  %v847_v38 = vunpack.c.h.bf16 %v1457_v53  ;;  %v894_v48 = vunpack.c.h.bf16 %v1472_v0  ;;  %v896_v51 = vunpack.c.h.bf16 %v1473_v1 }
 0x10b   : > { %1213 = vmatprep.subr.bf16.mxu0 %v1191_v37  ;;  %v1100_v17 = vadd.f32 %v1068_v62, %v1036_v36  ;;  %v943_v8 = vunpack.c.h.bf16 %v1488_v26  ;;  %v945_v14 = vunpack.c.h.bf16 %v1489_v28  ;;  %v975_v52 = vmul.f32 %v796_v29, %v2298_v10  ;;  %v2665_v37 = vld [vmem:[#allocation21_spill] sm:$0xff] }
 0x10c   : > { %v1162_v59 = vadd.f32 %v1130_v57, %v1098_v5  ;;  %v977_v63 = vmul.f32 %v798_v21, %v2300_v11  ;;  %v1007_v19 = vmul.f32 %v845_v4, %v2307_v23  ;;  %v1009_v35 = vmul.f32 %v847_v38, %v2328_v40 }
 0x10d   : > { %v1164_v30 = vadd.f32 %v1132_v13, %v1100_v17  ;;  %v1071_v24 = vmul.f32 %v894_v48, %v2330_v16  ;;  %v1073_v58 = vmul.f32 %v896_v51, %v2333_v42  ;;  %v1135_v25 = vmul.f32 %v943_v8, %v2664_v39 }
 0x10e   : > { %v1039_v9 = vadd.f32 %v1007_v19, %v975_v52  ;;  %v1041_v62 = vadd.f32 %v1009_v35, %v977_v63  ;;  %v1137_v36 = vmul.f32 %v945_v14, %v2665_v37  ;;  %v795_v57 = vunpack.c.l.bf16 %v773_v32  ;;  %v775_v14 = vld [vmem:[%s2092_s16 + $0x40] sm:$0xff] }
 0x10f   : > { %v1190_v29 = vpack.c.bf16 %v1164_v30, %v1162_v59  ;;  %v797_v21 = vunpack.c.l.bf16 %v774_v34  ;;  %v844_v5 = vunpack.c.l.bf16 %v1456_v15  ;;  %v846_v4 = vunpack.c.l.bf16 %v1457_v53  ;;  %v776_v34 = vld [vmem:[%s2092_s16 + $0x48] sm:$0xff]  ;;  %v1474_v19 = vld [vmem:[%s2092_s16 + $0x140] sm:$0xff] }
 0x110   : > { %v1103_v38 = vadd.f32 %v1071_v24, %v1039_v9  ;;  %v1105_v13 = vadd.f32 %v1073_v58, %v1041_v62  ;;  %v893_v48 = vunpack.c.l.bf16 %v1472_v0  ;;  %v895_v51 = vunpack.c.l.bf16 %v1473_v1  ;;  %v1458_v0 = vld [vmem:[%s2092_s16 + $0xc0] sm:$0xff]  ;;  %v1459_v1 = vld [vmem:[%s2092_s16 + $0xc8] sm:$0xff] }
 0x111   : > { %1214 = vmatpush1.bf16.msra.mxu0 %v1190_v29  ;;  %v942_v17 = vunpack.c.l.bf16 %v1488_v26  ;;  %v944_v8 = vunpack.c.l.bf16 %v1489_v28  ;;  %v974_v52 = vmul.f32 %v795_v57, %v2380_v6  ;;  %v976_v32 = vmul.f32 %v797_v21, %v2382_v60  ;;  %v1475_v24 = vld [vmem:[%s2092_s16 + $0x148] sm:$0xff]  ;;  %v1490_v58 = vld [vmem:[%s2092_s16 + $0x1c0] sm:$0xff] }
 0x112   : > { %v1167_v15 = vadd.f32 %v1135_v25, %v1103_v38  ;;  %v1169_v53 = vadd.f32 %v1137_v36, %v1105_v13  ;;  %v1006_v59 = vmul.f32 %v844_v5, %v2386_v47  ;;  %v1008_v63 = vmul.f32 %v846_v4, %v2390_v22  ;;  %v1491_v57 = vld [vmem:[%s2092_s16 + $0x1c8] sm:$0xff] }
 0x113   : > { %v1070_v26 = vmul.f32 %v893_v48, %v2392_v20  ;;  %v1072_v28 = vmul.f32 %v895_v51, %v2395_v41  ;;  %v1134_v35 = vmul.f32 %v942_v17, %v2399_v2  ;;  %v1136_v30 = vmul.f32 %v944_v8, %v2406_v44 }
 0x114   : > { %v1193_v25 = vpack.c.bf16 %v1169_v53, %v1167_v15  ;;  %v1038_v9 = vadd.f32 %v1006_v59, %v974_v52  ;;  %v1040_v62 = vadd.f32 %v1008_v63, %v976_v32  ;;  %v800_v36 = vunpack.c.h.bf16 %v775_v14 }
 0x115   : > { %v802_v29 = vunpack.c.h.bf16 %v776_v34  ;;  %v849_v21 = vunpack.c.h.bf16 %v1458_v0  ;;  %v851_v5 = vunpack.c.h.bf16 %v1459_v1  ;;  %v898_v4 = vunpack.c.h.bf16 %v1474_v19 }
 0x116   : > { %1215 = vmatprep.subr.bf16.mxu0 %v1193_v25  ;;  %v1102_v38 = vadd.f32 %v1070_v26, %v1038_v9  ;;  %v1104_v13 = vadd.f32 %v1072_v28, %v1040_v62  ;;  %v900_v48 = vunpack.c.h.bf16 %v1475_v24  ;;  %v947_v51 = vunpack.c.h.bf16 %v1490_v58 }
 0x117   : > { %v949_v41 = vunpack.c.h.bf16 %v1491_v57  ;;  %v979_v17 = vmul.f32 %v800_v36, %v2145_v49  ;;  %v981_v8 = vmul.f32 %v802_v29, %v2147_v50  ;;  %v1011_v15 = vmul.f32 %v849_v21, %v2157_v55 }
 0x118   : > { %v1166_v52 = vadd.f32 %v1134_v35, %v1102_v38  ;;  %v1168_v32 = vadd.f32 %v1136_v30, %v1104_v13  ;;  %v1013_v53 = vmul.f32 %v851_v5, %v2159_v56  ;;  %v1075_v59 = vmul.f32 %v898_v4, %v2175_v3 }
 0x119   : > { %v1043_v63 = vadd.f32 %v1011_v15, %v979_v17  ;;  %v1077_v25 = vmul.f32 %v900_v48, %v2179_v7  ;;  %v1139_v26 = vmul.f32 %v947_v51, %v2184_v12  ;;  %v1141_v28 = vmul.f32 %v949_v41, %v2190_v18  ;;  %v777_v51 = vld [vmem:[%s2092_s16 + $0x50] sm:$0xff] }
 0x11a   : > { %v1192_v9 = vpack.c.bf16 %v1168_v32, %v1166_v52  ;;  %v1045_v62 = vadd.f32 %v1013_v53, %v981_v8  ;;  %v799_v36 = vunpack.c.l.bf16 %v775_v14  ;;  %v801_v29 = vunpack.c.l.bf16 %v776_v34  ;;  %v1476_v15 = vld [vmem:[%s2092_s16 + $0x150] sm:$0xff]  ;;  %v1477_v52 = vld [vmem:[%s2092_s16 + $0x158] sm:$0xff] }
 0x11b   : > { %v1107_v35 = vadd.f32 %v1075_v59, %v1043_v63  ;;  %v848_v30 = vunpack.c.l.bf16 %v1458_v0  ;;  %v850_v21 = vunpack.c.l.bf16 %v1459_v1  ;;  %v897_v5 = vunpack.c.l.bf16 %v1474_v19  ;;  %v778_v0 = vld [vmem:[%s2092_s16 + $0x58] sm:$0xff]  ;;  %v1460_v1 = vld [vmem:[%s2092_s16 + $0xd0] sm:$0xff] }
 0x11c   : > { %1216 = vmatpush1.bf16.msra.mxu0 %v1192_v9  ;;  %v1109_v4 = vadd.f32 %v1077_v25, %v1045_v62  ;;  %v899_v38 = vunpack.c.l.bf16 %v1475_v24  ;;  %v946_v13 = vunpack.c.l.bf16 %v1490_v58  ;;  %v948_v48 = vunpack.c.l.bf16 %v1491_v57  ;;  %v1461_v57 = vld [vmem:[%s2092_s16 + $0xd8] sm:$0xff]  ;;  %v1492_v25 = vld [vmem:[%s2092_s16 + $0x1d0] sm:$0xff] }
 0x11d   : > { %v1171_v41 = vadd.f32 %v1139_v26, %v1107_v35  ;;  %v978_v17 = vmul.f32 %v799_v36, %v2225_v27  ;;  %v980_v14 = vmul.f32 %v801_v29, %v2228_v31  ;;  %v1010_v34 = vmul.f32 %v848_v30, %v2230_v33  ;;  %v1493_v26 = vld [vmem:[%s2092_s16 + $0x1d8] sm:$0xff] }
 0x11e   : > { %v1173_v19 = vadd.f32 %v1141_v28, %v1109_v4  ;;  %v1012_v8 = vmul.f32 %v850_v21, %v2235_v43  ;;  %v1074_v24 = vmul.f32 %v897_v5, %v2239_v45  ;;  %v1076_v58 = vmul.f32 %v899_v38, %v2241_v46 }
 0x11f   : > { %v1042_v32 = vadd.f32 %v1010_v34, %v978_v17  ;;  %v1138_v53 = vmul.f32 %v946_v13, %v2249_v61  ;;  %v1140_v59 = vmul.f32 %v948_v48, %v2255_v54  ;;  %v804_v63 = vunpack.c.h.bf16 %v777_v51 }
 0x120   : > { %v1195_v9 = vpack.c.bf16 %v1173_v19, %v1171_v41  ;;  %v1044_v62 = vadd.f32 %v1012_v8, %v980_v14  ;;  %v806_v28 = vunpack.c.h.bf16 %v778_v0  ;;  %v853_v36 = vunpack.c.h.bf16 %v1460_v1 }
 0x121   : > { %v1106_v29 = vadd.f32 %v1074_v24, %v1042_v32  ;;  %v855_v35 = vunpack.c.h.bf16 %v1461_v57  ;;  %v902_v30 = vunpack.c.h.bf16 %v1476_v15  ;;  %v904_v21 = vunpack.c.h.bf16 %v1477_v52 }
 0x122   : > { %1217 = vmatprep.subr.bf16.mxu0 %v1195_v9  ;;  %v1108_v5 = vadd.f32 %v1076_v58, %v1044_v62  ;;  %v951_v4 = vunpack.c.h.bf16 %v1492_v25  ;;  %v953_v38 = vunpack.c.h.bf16 %v1493_v26  ;;  %v983_v17 = vmul.f32 %v804_v63, %v2298_v10 }
 0x123   : > { %v1170_v13 = vadd.f32 %v1138_v53, %v1106_v29  ;;  %v985_v48 = vmul.f32 %v806_v28, %v2300_v11  ;;  %v1015_v34 = vmul.f32 %v853_v36, %v2307_v23  ;;  %v1017_v41 = vmul.f32 %v855_v35, %v2328_v40 }
 0x124   : > { %v1172_v14 = vadd.f32 %v1140_v59, %v1108_v5  ;;  %v1079_v19 = vmul.f32 %v902_v30, %v2330_v16  ;;  %v1081_v8 = vmul.f32 %v904_v21, %v2333_v42  ;;  %v1143_v24 = vmul.f32 %v951_v4, %v2664_v39 }
 0x125   : > { %v1047_v32 = vadd.f32 %v1015_v34, %v983_v17  ;;  %v1049_v58 = vadd.f32 %v1017_v41, %v985_v48  ;;  %v1145_v9 = vmul.f32 %v953_v38, %v2665_v37  ;;  %v803_v53 = vunpack.c.l.bf16 %v777_v51  ;;  %v779_v38 = vld [vmem:[%s2092_s16 + $0x60] sm:$0xff] }
 0x126   : > { %v1194_v63 = vpack.c.bf16 %v1172_v14, %v1170_v13  ;;  %v805_v62 = vunpack.c.l.bf16 %v778_v0  ;;  %v852_v28 = vunpack.c.l.bf16 %v1460_v1  ;;  %v854_v36 = vunpack.c.l.bf16 %v1461_v57  ;;  %v780_v0 = vld [vmem:[%s2092_s16 + $0x68] sm:$0xff]  ;;  %v1478_v48 = vld [vmem:[%s2092_s16 + $0x160] sm:$0xff] }
 0x127   : > { %v1111_v29 = vadd.f32 %v1079_v19, %v1047_v32  ;;  %v1113_v59 = vadd.f32 %v1081_v8, %v1049_v58  ;;  %v901_v35 = vunpack.c.l.bf16 %v1476_v15  ;;  %v903_v30 = vunpack.c.l.bf16 %v1477_v52  ;;  %v1462_v15 = vld [vmem:[%s2092_s16 + $0xe0] sm:$0xff]  ;;  %v1463_v52 = vld [vmem:[%s2092_s16 + $0xe8] sm:$0xff] }
 0x128   : > { %1218 = vmatpush1.bf16.msra.mxu0 %v1194_v63  ;;  %v950_v21 = vunpack.c.l.bf16 %v1492_v25  ;;  %v952_v5 = vunpack.c.l.bf16 %v1493_v26  ;;  %v982_v4 = vmul.f32 %v803_v53, %v2380_v6  ;;  %v984_v51 = vmul.f32 %v805_v62, %v2382_v60  ;;  %v2666_v26 = vld [vmem:[#allocation22_spill] sm:$0xff]  ;;  %v1479_v19 = vld [vmem:[%s2092_s16 + $0x168] sm:$0xff]  ;;  %v1494_v8 = vld [vmem:[%s2092_s16 + $0x1e0] sm:$0xff] }
 0x129   : > { %v1175_v1 = vadd.f32 %v1143_v24, %v1111_v29  ;;  %v1177_v57 = vadd.f32 %v1145_v9, %v1113_v59  ;;  %v1014_v17 = vmul.f32 %v852_v28, %v2386_v47  ;;  %v1016_v13 = vmul.f32 %v854_v36, %v2390_v22  ;;  %v1495_v53 = vld [vmem:[%s2092_s16 + $0x1e8] sm:$0xff] }
 0x12a   : > { %v1078_v25 = vmul.f32 %v901_v35, %v2392_v20  ;;  %v1080_v34 = vmul.f32 %v903_v30, %v2666_v26  ;;  %v1142_v41 = vmul.f32 %v950_v21, %v2399_v2  ;;  %v1144_v14 = vmul.f32 %v952_v5, %v2406_v44 }
 0x12b   : > { %v1197_v24 = vpack.c.bf16 %v1177_v57, %v1175_v1  ;;  %v1046_v32 = vadd.f32 %v1014_v17, %v982_v4  ;;  %v1048_v58 = vadd.f32 %v1016_v13, %v984_v51  ;;  %v808_v9 = vunpack.c.h.bf16 %v779_v38 }
 0x12c   : > { %v810_v63 = vunpack.c.h.bf16 %v780_v0  ;;  %v857_v62 = vunpack.c.h.bf16 %v1462_v15  ;;  %v859_v28 = vunpack.c.h.bf16 %v1463_v52  ;;  %v906_v36 = vunpack.c.h.bf16 %v1478_v48 }
 0x12d   : > { %1219 = vmatprep.subr.bf16.mxu0 %v1197_v24  ;;  %v1110_v29 = vadd.f32 %v1078_v25, %v1046_v32  ;;  %v1112_v59 = vadd.f32 %v1080_v34, %v1048_v58  ;;  %v908_v35 = vunpack.c.h.bf16 %v1479_v19  ;;  %v955_v30 = vunpack.c.h.bf16 %v1494_v8 }
 0x12e   : > { %v957_v26 = vunpack.c.h.bf16 %v1495_v53  ;;  %v987_v21 = vmul.f32 %v808_v9, %v2145_v49  ;;  %v989_v5 = vmul.f32 %v810_v63, %v2147_v50  ;;  %v1019_v1 = vmul.f32 %v857_v62, %v2157_v55  ;;  %v781_v63 = vld [vmem:[%s2092_s16 + $0x70] sm:$0xff] }
 0x12f   : > { %v1174_v4 = vadd.f32 %v1142_v41, %v1110_v29  ;;  %v1176_v51 = vadd.f32 %v1144_v14, %v1112_v59  ;;  %v1021_v57 = vmul.f32 %v859_v28, %v2159_v56  ;;  %v1083_v17 = vmul.f32 %v906_v36, %v2175_v3  ;;  %v1480_v28 = vld [vmem:[%s2092_s16 + $0x170] sm:$0xff]  ;;  %v1481_v36 = vld [vmem:[%s2092_s16 + $0x178] sm:$0xff] }
 0x130   : > { %v1051_v13 = vadd.f32 %v1019_v1, %v987_v21  ;;  %v1085_v24 = vmul.f32 %v908_v35, %v2179_v7  ;;  %v1147_v25 = vmul.f32 %v955_v30, %v2184_v12  ;;  %v1149_v34 = vmul.f32 %v957_v26, %v2190_v18  ;;  %v1496_v35 = vld [vmem:[%s2092_s16 + $0x1f0] sm:$0xff] }
 0x131   : > { %v1196_v32 = vpack.c.bf16 %v1176_v51, %v1174_v4  ;;  %v1053_v49 = vadd.f32 %v1021_v57, %v989_v5  ;;  %v807_v58 = vunpack.c.l.bf16 %v779_v38  ;;  %v809_v50 = vunpack.c.l.bf16 %v780_v0 }
 0x132   : > { %v1115_v55 = vadd.f32 %v1083_v17, %v1051_v13  ;;  %v856_v41 = vunpack.c.l.bf16 %v1462_v15  ;;  %v858_v14 = vunpack.c.l.bf16 %v1463_v52  ;;  %v905_v56 = vunpack.c.l.bf16 %v1478_v48  ;;  %v782_v15 = vld [vmem:[%s2092_s16 + $0x78] sm:$0xff]  ;;  %v1464_v52 = vld [vmem:[%s2092_s16 + $0xf0] sm:$0xff] }
 0x133   : > { %1220 = vmatpush1.bf16.msra.mxu0 %v1196_v32  ;;  %v1117_v3 = vadd.f32 %v1085_v24, %v1053_v49  ;;  %v907_v7 = vunpack.c.l.bf16 %v1479_v19  ;;  %v954_v9 = vunpack.c.l.bf16 %v1494_v8  ;;  %v956_v12 = vunpack.c.l.bf16 %v1495_v53  ;;  %v1465_v53 = vld [vmem:[%s2092_s16 + $0xf8] sm:$0xff] }
 0x134   : > { %v1179_v18 = vadd.f32 %v1147_v25, %v1115_v55  ;;  %v986_v26 = vmul.f32 %v807_v58, %v2225_v27  ;;  %v988_v38 = vmul.f32 %v809_v50, %v2228_v31  ;;  %v1018_v0 = vmul.f32 %v856_v41, %v2230_v33  ;;  %v1497_v33 = vld [vmem:[%s2092_s16 + $0x1f8] sm:$0xff]  ;;  %s1814_s16 = smov [#allocation10]  }
 0x135   : > { %v1181_v48 = vadd.f32 %v1149_v34, %v1117_v3  ;;  %v1020_v62 = vmul.f32 %v858_v14, %v2235_v43  ;;  %v1082_v19 = vmul.f32 %v905_v56, %v2239_v45  ;;  %v1084_v8 = vmul.f32 %v907_v7, %v2241_v46  ;;  %s1716_s13 = sshll.u32 %s1814_s16, 4  ;;  %s1717_s13 = int_to_ptr.vmem [resolvable:$false] %s1716_s13 }
 0x136   : > { %v1050_v29 = vadd.f32 %v1018_v0, %v986_v26  ;;  %v1146_v27 = vmul.f32 %v954_v9, %v2249_v61  ;;  %v1148_v31 = vmul.f32 %v956_v12, %v2255_v54  ;;  %v812_v59 = vunpack.c.h.bf16 %v781_v63  ;;  %v2667_v0 = vld [vmem:[#allocation22_spill] sm:$0xff]  ;;  %s1718_s28 = scalar_lea.vmem %s1717_s13, 512  ;;  %p1719_p11 = scmp.lt.s32.totalorder %s2571_s1, %s1717_s13 }
 0x137   : > { %v1199_v30 = vpack.c.bf16 %v1181_v48, %v1179_v18  ;;  %v1052_v21 = vadd.f32 %v1020_v62, %v988_v38  ;;  %v814_v5 = vunpack.c.h.bf16 %v782_v15  ;;  %v861_v1 = vunpack.c.h.bf16 %v1464_v52  ;;  %p1720_p7 = scmp.lt.s32.totalorder %s1718_s28, %s1712_s7 }
 0x138   : > { %v1114_v43 = vadd.f32 %v1082_v19, %v1050_v29  ;;  %v863_v4 = vunpack.c.h.bf16 %v1465_v53  ;;  %v910_v45 = vunpack.c.h.bf16 %v1480_v28  ;;  %v912_v51 = vunpack.c.h.bf16 %v1481_v36 }
 0x139   : > { %1221 = vmatprep.subr.bf16.mxu0 %v1199_v30  ;;  %v1116_v46 = vadd.f32 %v1084_v8, %v1052_v21  ;;  %v959_v57 = vunpack.c.h.bf16 %v1496_v35  ;;  %v961_v17 = vunpack.c.h.bf16 %v1497_v33  ;;  %v991_v13 = vmul.f32 %v812_v59, %v2298_v10  ;;  %p1721_p3 = por %p1720_p7, %p1719_p11 }
 0x13a   : > { %v1178_v61 = vadd.f32 %v1146_v27, %v1114_v43  ;;  %v993_v54 = vmul.f32 %v814_v5, %v2300_v11  ;;  %v1023_v24 = vmul.f32 %v861_v1, %v2307_v23  ;;  %v1025_v25 = vmul.f32 %v863_v4, %v2328_v40 }
 0x13b   : > { %v1180_v34 = vadd.f32 %v1148_v31, %v1116_v46  ;;  %v1087_v32 = vmul.f32 %v910_v45, %v2330_v16  ;;  %v1089_v49 = vmul.f32 %v912_v51, %v2333_v42  ;;  %v1151_v58 = vmul.f32 %v959_v57, %v2664_v39  ;;  %p1722_p5 = pnand %p1721_p3, %p1715_p13 }
 0x13c   : > { %v1055_v50 = vadd.f32 %v1023_v24, %v991_v13  ;;  %v1057_v55 = vadd.f32 %v1025_v25, %v993_v54  ;;  %v1153_v41 = vmul.f32 %v961_v17, %v2665_v37  ;;  %v811_v14 = vunpack.c.l.bf16 %v781_v63 }
 0x13d   : > { %v1198_v10 = vpack.c.bf16 %v1180_v34, %v1178_v61  ;;  %v813_v56 = vunpack.c.l.bf16 %v782_v15  ;;  %v860_v3 = vunpack.c.l.bf16 %v1464_v52  ;;  %v862_v11 = vunpack.c.l.bf16 %v1465_v53 }
 0x13e   : > { %v1119_v7 = vadd.f32 %v1087_v32, %v1055_v50  ;;  %v1121_v23 = vadd.f32 %v1089_v49, %v1057_v55  ;;  %v909_v9 = vunpack.c.l.bf16 %v1480_v28  ;;  %v911_v40 = vunpack.c.l.bf16 %v1481_v36 }
 0x13f   : > { %1222 = vmatpush1.bf16.msra.mxu0 %v1198_v10  ;;  %v958_v12 = vunpack.c.l.bf16 %v1496_v35  ;;  %v960_v16 = vunpack.c.l.bf16 %v1497_v33  ;;  %v990_v42 = vmul.f32 %v811_v14, %v2380_v6  ;;  %v992_v39 = vmul.f32 %v813_v56, %v2382_v60  ;;  %v1203_v6 = vld [vmem:[%s2623_s5] sm:$0xff] }
 0x140   : > { %v1183_v18 = vadd.f32 %v1151_v58, %v1119_v7  ;;  %v1185_v26 = vadd.f32 %v1153_v41, %v1121_v23  ;;  %v1022_v37 = vmul.f32 %v860_v3, %v2386_v47  ;;  %v1024_v63 = vmul.f32 %v862_v11, %v2390_v22 }
 0x141   : > { %v1086_v38 = vmul.f32 %v909_v9, %v2392_v20  ;;  %v1088_v15 = vmul.f32 %v911_v40, %v2667_v0  ;;  %v1150_v52 = vmul.f32 %v958_v12, %v2399_v2  ;;  %v1152_v48 = vmul.f32 %v960_v16, %v2406_v44  ;;  %v1202_v44 = vld [vmem:[%s2622_s4] sm:$0xf] }
 0x142   : > { %v1201_v62 = vpack.c.bf16 %v1185_v26, %v1183_v18  ;;  %v1054_v60 = vadd.f32 %v1022_v37, %v990_v42  ;;  %v1056_v19 = vadd.f32 %v1024_v63, %v992_v39  ;;  %v1813_v47 = vmov 0  }
 0x143   : > { %1241 = vmatprep.mubr.bf16.mxu0 %v1813_v47  ;;  %1591 = vset.pattern.permute.xlu0 %v1813_v47 }
 0x144   : > { %1223 = vmatprep.subr.bf16.mxu0 %v1201_v62  ;;  %v1118_v22 = vadd.f32 %v1086_v38, %v1054_v60  ;;  %v1120_v20 = vadd.f32 %v1088_v15, %v1056_v19  ;;  %1206 = vperm.xlu0 %1591, %v1203_v6  }
 0x146   : > { %v1182_v8 = vadd.f32 %v1150_v52, %v1118_v22  ;;  %v1184_v2 = vadd.f32 %v1152_v48, %v1120_v20 }
 0x148   : > { %v1200_v53 = vpack.c.bf16 %v1184_v2, %v1182_v8 }
 0x14a   : > { %1224 = vmatpush1.bf16.msra.mxu0 %v1200_v53 }
 0x14d   : > { %1242 = vmatmul.mubr.bf16.vlgmr.msra.gmra.mrb[0].mxu0 %v1202_v44 }
 0x1c3   : > { %v1207_v28 = vpop.permute.xlu0 %1206 }
 0x220   : > { %v1243_v36 = vpop.f32.mrb[0].mxu0 }
 0x221   : > { %v1244_v29 = vadd.f32 %v1243_v36, %v1207_v28  ;;  %v1245_v27 = vpop.f32.mrb[1].mxu0 }
 0x222   : > { %v1246_v31 = vadd.f32 %v1245_v27, %v1207_v28  ;;  %v1247_v59 = vpop.f32.mrb[2].mxu0 }
 0x223   : > { %1250 = vst [vmem:[%s416_s15] sm:$0xff] %v1244_v29  ;;  %v1248_v35 = vpop.f32.mrb[3].mxu0 }
 0x224   : > { %1251 = vst [vmem:[%s416_s15 + $0x8] sm:$0xff] %v1246_v31 }
 0x225   : > { %1725 = shalt.err (!%p1722_p5)
}
 0x226   : > { %s1726_s29 = scalar_lea.hbm %s2569_s18, 256  ;;  %s1730_s20 = scalar_lea.hbm %s2624_s6, 512 }
 0x227   : > { %p1727_p1 = scmp.ne.s32.totalorder %s2569_s18, %s1726_s29  ;;  %p1731_p12 = scmp.lt.u32.totalorder %s2569_s18, %s2624_s6 }
 0x228   : > { %p1732_p2 = scmp.lt.u32.totalorder %s1730_s20, %s1726_s29  ;;  %p1734_p0 = scmp.lt.u32.totalorder %s1726_s29, %s2569_s18 }
 0x229   : > { %p1728_p6 = pnand %p1727_p1, %p2668_p4 }
 0x22a   : > { %p1733_p8 = por %p1732_p2, %p1731_p12 }
 0x22b   : > { %p1729_p9 = pneg %p1728_p6 }
 0x22c   : > { %p1735_p10 = por %p1734_p0, %p1733_p8 }
 0x22e   : > { %p1736_p13 = pnand %p1735_p10, %p1729_p9 }
 0x230   : > { %1739 = shalt.err (!%p1736_p13)
}
 0x231   : > { %1516 = dma.vmem_to_hbm [thread:$0]  (%p2668_p4), %s2571_s1, 256, %s2569_s18, %s1253_s24  }
 0x232 PF: > { %s2669_s27 = sld [smem:[#allocation15_spill]]  ;;  %s2670_s9 = sld [smem:[#allocation19_spill]] }
 0x233   : > { %p2672_p7 = scmp.ge.s32.totalorder %s1802_s26, 2 }
 0x238   : > { %s1281_s11 = sand.u32 1, %s2669_s27   ;;  %p2671_p11 = scmp.ne.s32.totalorder %s2670_s9, 0 }
 0x239   : > { %s1282_s8 = scalar_lea.sflag [#allocation4], %s1281_s11 }
 0x23a   : > { %p1532_p3 = pnand %p2672_p7, %p2671_p11 }
 0x23c   : > { %1777 = dma.done.wait (!%p1532_p3), %s1282_s8, 256  }
 0x23d   : > { %1779 = vsyncadd (!%p1532_p3), %s1282_s8, 4294967040  ;;  %s28_s26 = sadd.s32 1, %s1802_s26   ;;  %s2673_s17 = sld [smem:[#allocation16_spill]] }
 0x23e   : > { %p25_p5 = scmp.ge.s32.totalorder %s28_s26, 4   ;;  %s2674_s23 = sld [smem:[#allocation18_spill]] }
 0x23f   : > { %s2675_s10 = sld [smem:[#allocation17_spill]]  ;;  %s2676_s21 = smov %s1786_s22 }
 0x240   : > { %s2678_s24 = smov %s1798_s25  ;;  %27 = sbr.rel (!%p25_p5) target bundleno = 13 (0xd), region = 129 }
 0x243   : > { %s2677_s22 = smov %s2673_s17 }
 0x245   : > { %s2679_s25 = smov %s2675_s10 }
 0x247   :  { %1287 = vsyncpa [#allocation3], 1 }
 0x248   :  { %1289 = vsyncpa [#allocation3 + $0x1], 1 }
 0x249   :  { %1290 = vsyncpa [#allocation6], 1 }
 0x24a   :  { %1292 = vsyncpa [#allocation6 + $0x1], 1 }
 0x24b   :  { %1293 = vsyncpa [#allocation9], 1 }
 0x24c   :  { %1295 = vsyncpa [#allocation9 + $0x1], 1 }
 0x24d   :  { %1296 = vsyncpa [#allocation4], 1 }
 0x24e   :  { %1298 = vsyncpa [#allocation4 + $0x1], 1 }

</bundles_post_ra>
